<compile_context>
chip_gen: v7x
topology: tpu7x:2x2x1
jax: 0.10.0
libtpu: 0.0.40
codegen_flags: <defaults>
</compile_context>

<pallas_src>
import functools

import jax
import jax.numpy as jnp
from jax.experimental import pallas as pl
from jax.experimental.pallas import tpu as pltpu


def _vmem():
    # Whole-array block resident in VMEM (all operands here are tiny).
    return pl.BlockSpec(memory_space=pltpu.MemorySpace.VMEM)


# -----------------------------------------------------------------------------
# Kernel 1: fused GCN stack
#   h_i = tanh(A_hat @ (h_{i-1} @ W_i) + b_i), all layers unrolled; the
#   concatenated feature matrix is written with ONE lane-dense (N, 128) store.
# -----------------------------------------------------------------------------
def _gcn_stack_kernel(*refs, num_convs):
    a_ref, x_ref = refs[0], refs[1]
    o_ref = refs[-1]
    wb = refs[2:-1]                       # w0, b0, w1, b1, ...
    a = a_ref[...]
    h = x_ref[...]
    parts = []
    for i in range(num_convs):
        w = wb[2 * i][...]
        b = wb[2 * i + 1][...]
        xw = jnp.dot(h, w, preferred_element_type=jnp.float32)
        h = jnp.tanh(jnp.dot(a, xw, preferred_element_type=jnp.float32) + b)
        parts.append(h)
    # Single unmasked full-width store (layer widths sum to the padded width).
    o_ref[...] = jnp.concatenate(parts, axis=-1).astype(o_ref.dtype)


def gcn_stack(a_hat, x0, conv_ws, conv_bs, d_pad):
    # TODO(synk): the fused multi-layer stack cannot be row-tiled in a single
    # pallas_call (layer i of a row tile needs ALL rows of layer i-1); scaling
    # past VMEM (N >~ 2-3k, earlier on v7x's 64 MiB) needs per-layer row-tiled
    # calls with a "parallel" row grid and/or bf16 MXU operands.
    n = a_hat.shape[0]
    widths = tuple(int(w.shape[1]) for w in conv_ws)
    assert sum(widths) == d_pad
    ins = [a_hat, x0]
    for w, b in zip(conv_ws, conv_bs):
        ins += [w, b]

    in_bytes = sum(int(x.size) * 4 for x in ins)
    out_bytes = n * d_pad * 4
    flops = 0
    k_in = int(x0.shape[1])
    for width in widths:
        flops += 2 * n * k_in * width + 2 * n * n * width
        k_in = width
    cost = pl.CostEstimate(flops=flops, transcendentals=n * d_pad,
                           bytes_accessed=in_bytes + out_bytes)
    vmem_bytes = min(max(4 * (in_bytes + out_bytes) + (1 << 20), 8 << 20),
                     48 << 20)

    return pl.pallas_call(
        functools.partial(_gcn_stack_kernel, num_convs=len(conv_ws)),
        out_shape=jax.ShapeDtypeStruct((n, d_pad), jnp.float32),
        in_specs=[_vmem()] * len(ins),
        out_specs=_vmem(),
        compiler_params=pltpu.CompilerParams(vmem_limit_bytes=vmem_bytes),
        cost_estimate=cost,
    )(*ins)


# -----------------------------------------------------------------------------
# Kernel 2: fused head (conv1 + ReLU + MaxPool1d + conv2 + ReLU + NCW flatten
#           + lin1 + ReLU + lin2), fully batched: 4 well-shaped matmuls, no
#           scratch round-trips, single output store.
#   Input rows are position-major: row = pos * B + graph; the first k_half*B
#   rows are the even positions, the last k_half*B rows the odd positions.
# -----------------------------------------------------------------------------
def _head_kernel(x_ref, w1_ref, b1_ref, w2_ref, b2_ref, v1_ref, bl1_ref,
                 wl2_ref, bl2_ref, o_ref, *, num_graphs, k_half, l_out,
                 conv2_ks):
    B = num_graphs
    khB = k_half * B

    # conv1 == Conv1d(1, 16, D, D): per-position dense layer, ONE matmul over
    # the stacked even+odd rows; MaxPool1d(2, 2) == elementwise max of halves.
    h1 = jnp.maximum(
        jnp.dot(x_ref[...], w1_ref[...], preferred_element_type=jnp.float32)
        + b1_ref[...], 0.0)                              # (2*khB, 16)
    pool = jnp.maximum(h1[:khB, :], h1[khB:, :])         # (khB, 16), row=l*B+g

    # conv2 == Conv1d(16, 32, 5, 1): im2col by lane-concatenating 5 contiguous
    # position-shifted slices, then ONE K=80 contraction.
    taps = [pool[t * B:(t + l_out) * B, :] for t in range(conv2_ks)]
    im2col = jnp.concatenate(taps, axis=1)               # (l_out*B, 5*16)
    h2 = jnp.maximum(
        jnp.dot(im2col, w2_ref[...], preferred_element_type=jnp.float32)
        + b2_ref[...], 0.0)                              # (l_out*B, 32)

    # PyTorch x.view(B, -1) flattens NCW: flat[c*l_out + l] = h2[l, c].  With
    # lin1's weight pre-permuted/flattened to rows indexed l*32 + c, the
    # flatten is a lane-concat of per-position (B, 32) blocks -> ONE matmul.
    h2_blocks = [h2[l * B:(l + 1) * B, :] for l in range(l_out)]
    h2_flat = jnp.concatenate(h2_blocks, axis=1)         # (B, l_out*32)
    h3 = jnp.maximum(
        jnp.dot(h2_flat, v1_ref[...], preferred_element_type=jnp.float32)
        + bl1_ref[...], 0.0)                             # (B, 128)
    # F.dropout(p=0.5, training=False) -> identity; then lin2.
    out = (jnp.dot(h3, wl2_ref[...], preferred_element_type=jnp.float32)
           + bl2_ref[...])                               # (B, 1)
    o_ref[...] = out.astype(o_ref.dtype)                 # single store


def head(x_stacked, kp, num_graphs, k_half, l_out, conv2_ks):
    # TODO(synk): if num_graphs grows large, add a grid over graphs (blocks of
    # k_half position-major rows, axis marked "parallel") so v7x's two
    # TensorCores split graphs and the input DMA pipelines behind compute.
    ins = [x_stacked, kp["conv1_w_k"], kp["conv1_b_k"], kp["conv2_w_k"],
           kp["conv2_b_k"], kp["lin1_v_k"], kp["lin1_b_k"], kp["lin2_w_k"],
           kp["lin2_b_k"]]
    return pl.pallas_call(
        functools.partial(_head_kernel, num_graphs=num_graphs, k_half=k_half,
                          l_out=l_out, conv2_ks=conv2_ks),
        out_shape=jax.ShapeDtypeStruct((num_graphs, 1), jnp.float32),
        in_specs=[_vmem()] * len(ins),
        out_specs=_vmem(),
    )(*ins)


# -----------------------------------------------------------------------------
# Glue (plain JAX)
# -----------------------------------------------------------------------------
def build_normalized_adj(edge_index, num_nodes):
    """GCN normalization: D^{-1/2} (A + I) D^{-1/2}  (dense, edge_weight=None).
    Note: duplicate edges collapse to weight 1 (PyG would count them twice)."""
    a = jnp.zeros((num_nodes, num_nodes), jnp.float32)
    a = a.at[edge_index[0], edge_index[1]].set(1.0)
    a = a + jnp.eye(num_nodes, dtype=jnp.float32)
    deg = a.sum(axis=1)
    dinv = jax.lax.rsqrt(deg)
    return a * dinv[:, None] * dinv[None, :]


def global_sort_pool(x, num_graphs, k, key_col):
    """torch_geometric.nn.global_sort_pool: per-graph sort (descending) by the
    last real feature channel, keep top-k rows, zero-pad if fewer than k."""
    # TODO(synk): assumes contiguous equal-size graphs; `batch` is not consulted
    # (per-graph argsort of a ragged batch has no clean Pallas equivalent).
    n, d = x.shape
    n_per = n // num_graphs
    xb = x.reshape(num_graphs, n_per, d)
    order = jnp.argsort(-xb[:, :, key_col], axis=1)       # descending
    xb = jnp.take_along_axis(xb, order[:, :, None], axis=1)
    if n_per >= k:
        xb = xb[:, :k]
    else:
        xb = jnp.pad(xb, ((0, 0), (0, k - n_per), (0, 0)))
    return xb                                             # (B, k, d)


def dgcnn_forward(kparams, z, edge_index, batch, num_graphs, k, hidden,
                  num_layers):
    del batch  # see TODO in global_sort_pool
    n = z.shape[0]
    d_real = hidden * num_layers + 1
    d_pad = 128 * pl.cdiv(d_real, 128)

    a_hat = build_normalized_adj(edge_index, n)
    h0 = kparams["z_emb"][z]                              # (N, hidden)

    # Fused GCN stack -> lane-dense (N, d_pad) slab, cols [0, d_real) are real.
    x = gcn_stack(a_hat, h0, kparams["conv_ws"], kparams["conv_bs"], d_pad)

    xb = global_sort_pool(x, num_graphs, k, key_col=d_real - 1)  # (B, k, d_pad)

    # Split positions into even/odd halves (floor semantics of MaxPool1d(2,2))
    # and lay rows out position-major (row = pos*B + graph) so the fused head
    # kernel's conv2 taps / lin1 blocks are contiguous static slices.
    k_half = k // 2
    k_eff = k_half * 2
    xe = jnp.transpose(xb[:, 0:k_eff:2, :], (1, 0, 2)).reshape(
        num_graphs * k_half, d_pad)
    xo = jnp.transpose(xb[:, 1:k_eff:2, :], (1, 0, 2)).reshape(
        num_graphs * k_half, d_pad)
    x_stacked = jnp.concatenate([xe, xo], axis=0)         # (2*B*k_half, d_pad)

    c1_out = kparams["conv1_w_k"].shape[1]
    conv2_ks = kparams["conv2_w_k"].shape[0] // c1_out
    l_out = k_half - conv2_ks + 1
    return head(x_stacked, kparams, num_graphs, k_half, l_out, conv2_ks)


# -----------------------------------------------------------------------------
# Parameters: synthetic init in PyTorch layouts + one-time kernel-layout prep
# -----------------------------------------------------------------------------
def init_params(key, hidden, num_layers, max_z, total_latent_dim, dense_dim):
    ks = jax.random.split(key, 32)

    def rnd(k_, shape, scale):
        return jax.random.normal(k_, shape, jnp.float32) * scale

    def glorot(k_, ci, co):
        return rnd(k_, (ci, co), jnp.sqrt(2.0 / (ci + co)))

    params = {"z_emb": rnd(ks[0], (max_z, hidden), 1.0)}
    # convs: (hidden->hidden) x num_layers, then (hidden->1)
    pairs = [(hidden, hidden)] * num_layers + [(hidden, 1)]
    convs = []
    for i, (ci, co) in enumerate(pairs):
        convs.append((glorot(ks[1 + i], ci, co), rnd(ks[8 + i], (co,), 0.01)))
    params["convs"] = convs
    # PyTorch layouts: Conv1d(1,16,D,D) weight (16,1,D); Conv1d(16,32,5,1) (32,16,5)
    params["conv1_w"] = rnd(ks[16], (16, 1, total_latent_dim),
                            jnp.sqrt(2.0 / (total_latent_dim + 16)))
    params["conv1_b"] = rnd(ks[17], (16,), 0.01)
    params["conv2_w"] = rnd(ks[18], (32, 16, 5), jnp.sqrt(2.0 / (16 * 5 + 32)))
    params["conv2_b"] = rnd(ks[19], (32,), 0.01)
    # Linear weights in PyTorch (out, in) layout.
    params["lin1_w"] = rnd(ks[20], (128, dense_dim),
                           jnp.sqrt(2.0 / (dense_dim + 128)))
    params["lin1_b"] = rnd(ks[21], (128,), 0.01)
    params["lin2_w"] = rnd(ks[22], (1, 128), jnp.sqrt(2.0 / 129))
    params["lin2_b"] = rnd(ks[23], (1,), 0.01)
    return params


def prepare_params(params, hidden, num_layers):
    """One-time conversion of PyTorch-layout params into kernel-ready layouts
    (all transposes/reshapes/flattening/zero-padding hoisted out of forward)."""
    d_real = hidden * num_layers + 1
    d_pad = 128 * pl.cdiv(d_real, 128)

    kp = {"z_emb": params["z_emb"]}

    conv_ws, conv_bs = [], []
    n_convs = len(params["convs"])
    for li, (w, b) in enumerate(params["convs"]):
        if li == n_convs - 1:
            # Zero-pad the final 1-channel layer so the fused GCN kernel fills a
            # full lane-dense slab; tanh(0) = 0 keeps the pad columns at zero.
            pad_w = d_pad - hidden * num_layers - w.shape[1]
            w = jnp.pad(w, ((0, 0), (0, pad_w)))
            b = jnp.pad(b, ((0, pad_w),))
        conv_ws.append(w)
        conv_bs.append(b.reshape(1, -1))
    kp["conv_ws"] = conv_ws
    kp["conv_bs"] = conv_bs

    # conv1: (16, 1, D) -> (D, 16), zero-padded on the contraction dim to d_pad.
    c1 = params["conv1_w"].shape[0]
    w1 = params["conv1_w"].reshape(c1, d_real).T
    kp["conv1_w_k"] = jnp.pad(w1, ((0, d_pad - d_real), (0, 0)))
    kp["conv1_b_k"] = params["conv1_b"].reshape(1, -1)

    # conv2: (32, 16, 5) -> (5, 16, 32) -> flat (5*16, 32) im2col weight
    # (row index = tap*16 + in_channel).
    c2, c1_in, ksz = params["conv2_w"].shape
    kp["conv2_w_k"] = jnp.transpose(params["conv2_w"],
                                    (2, 1, 0)).reshape(ksz * c1_in, c2)
    kp["conv2_b_k"] = params["conv2_b"].reshape(1, -1)

    # lin1: PyTorch (128, dense_dim) acts on the NCW-flattened conv2 output
    # (flat[c*l_out + l] = h2[l, c]); pre-permute/flatten so that row index
    # l*32 + c matches the head kernel's lane-concatenated (B, l_out*32) input.
    dense_dim = params["lin1_w"].shape[1]
    l_out = dense_dim // c2
    v = params["lin1_w"].T.reshape(c2, l_out, params["lin1_w"].shape[0])
    kp["lin1_v_k"] = jnp.transpose(v, (1, 0, 2)).reshape(l_out * c2, -1)
    kp["lin1_b_k"] = params["lin1_b"].reshape(1, -1)

    kp["lin2_w_k"] = params["lin2_w"].T                   # (128, 1)
    kp["lin2_b_k"] = params["lin2_b"].reshape(1, -1)
    return kp


# -----------------------------------------------------------------------------
# Main
# -----------------------------------------------------------------------------
if __name__ == "__main__":
    hidden, num_layers, max_z = 32, 3, 10
    k = 30                      # default k when train_dataset is None and k<=1
    B, n_per = 2, 40            # 2 graphs, 40 nodes each
    N = B * n_per

    key = jax.random.PRNGKey(0)
    kz, kp_key = jax.random.split(key)

    z = jax.random.randint(kz, (N,), 0, max_z)

    # Block-diagonal ring graph (both edge directions) per subgraph
    src, dst = [], []
    for g in range(B):
        off = g * n_per
        for i in range(n_per):
            j = (i + 1) % n_per
            src += [off + i, off + j]
            dst += [off + j, off + i]
    edge_index = jnp.array([src, dst], dtype=jnp.int32)
    batch = jnp.repeat(jnp.arange(B, dtype=jnp.int32), n_per)

    total_latent_dim = hidden * num_layers + 1            # 97
    pooled = (k - 2) // 2 + 1                             # 15
    dense_dim = (pooled - 5 + 1) * 32                     # 352

    params = init_params(kp_key, hidden, num_layers, max_z, total_latent_dim,
                         dense_dim)
    kparams = prepare_params(params, hidden, num_layers)

    fwd = jax.jit(functools.partial(dgcnn_forward, num_graphs=B, k=k,
                                    hidden=hidden, num_layers=num_layers))
    out = fwd(kparams, z, edge_index, batch)
    out = jax.block_until_ready(out)
    assert out.shape == (B, 1), out.shape
    assert bool(jnp.all(jnp.isfinite(out)))
    print("KERNEL_OK")
</pallas_src>

<mosaic_0001>
module attributes {stable_mosaic.version = 11 : i64} {
  func.func @_gcn_stack_kernel(%arg0: memref<80x80xf32, #tpu.memory_space<vmem>>, %arg1: memref<80x32xf32, #tpu.memory_space<vmem>>, %arg2: memref<32x32xf32, #tpu.memory_space<vmem>>, %arg3: memref<1x32xf32, #tpu.memory_space<vmem>>, %arg4: memref<32x32xf32, #tpu.memory_space<vmem>>, %arg5: memref<1x32xf32, #tpu.memory_space<vmem>>, %arg6: memref<32x32xf32, #tpu.memory_space<vmem>>, %arg7: memref<1x32xf32, #tpu.memory_space<vmem>>, %arg8: memref<32x32xf32, #tpu.memory_space<vmem>>, %arg9: memref<1x32xf32, #tpu.memory_space<vmem>>, %arg10: memref<80x128xf32, #tpu.memory_space<vmem>>) attributes {dimension_semantics = [], scalar_prefetch = 0 : i64, scratch_operands = 0 : i64, tpu.core_type = #tpu.core_type<tc>} {
    %c0 = arith.constant 0 : index
    %c0_0 = arith.constant 0 : index
    %0 = vector.load %arg0[%c0, %c0_0] : memref<80x80xf32, #tpu.memory_space<vmem>>, vector<80x80xf32>
    %c0_1 = arith.constant 0 : index
    %c0_2 = arith.constant 0 : index
    %1 = vector.load %arg1[%c0_1, %c0_2] : memref<80x32xf32, #tpu.memory_space<vmem>>, vector<80x32xf32>
    %c0_3 = arith.constant 0 : index
    %c0_4 = arith.constant 0 : index
    %2 = vector.load %arg2[%c0_3, %c0_4] : memref<32x32xf32, #tpu.memory_space<vmem>>, vector<32x32xf32>
    %c0_5 = arith.constant 0 : index
    %c0_6 = arith.constant 0 : index
    %3 = vector.load %arg3[%c0_5, %c0_6] : memref<1x32xf32, #tpu.memory_space<vmem>>, vector<1x32xf32>
    %cst = arith.constant dense<0.000000e+00> : vector<80x32xf32>
    %4 = tpu.matmul %1, %2, %cst {dimension_numbers = #tpu.dot_dimension_numbers<[1], [0], [0], [1], [0, 0, 1, 1], [], []>} : vector<80x32xf32>, vector<32x32xf32>, vector<80x32xf32> -> vector<80x32xf32>
    %cst_7 = arith.constant dense<0.000000e+00> : vector<80x32xf32>
    %5 = tpu.matmul %0, %4, %cst_7 {dimension_numbers = #tpu.dot_dimension_numbers<[1], [0], [0], [1], [0, 0, 1, 1], [], []>} : vector<80x80xf32>, vector<80x32xf32>, vector<80x32xf32> -> vector<80x32xf32>
    %6 = vector.broadcast %3 : vector<1x32xf32> to vector<80x32xf32>
    %7 = arith.addf %5, %6 : vector<80x32xf32>
    %8 = math.tanh %7 : vector<80x32xf32>
    %c0_8 = arith.constant 0 : index
    %c0_9 = arith.constant 0 : index
    %9 = vector.load %arg4[%c0_8, %c0_9] : memref<32x32xf32, #tpu.memory_space<vmem>>, vector<32x32xf32>
    %c0_10 = arith.constant 0 : index
    %c0_11 = arith.constant 0 : index
    %10 = vector.load %arg5[%c0_10, %c0_11] : memref<1x32xf32, #tpu.memory_space<vmem>>, vector<1x32xf32>
    %cst_12 = arith.constant dense<0.000000e+00> : vector<80x32xf32>
    %11 = tpu.matmul %8, %9, %cst_12 {dimension_numbers = #tpu.dot_dimension_numbers<[1], [0], [0], [1], [0, 0, 1, 1], [], []>} : vector<80x32xf32>, vector<32x32xf32>, vector<80x32xf32> -> vector<80x32xf32>
    %cst_13 = arith.constant dense<0.000000e+00> : vector<80x32xf32>
    %12 = tpu.matmul %0, %11, %cst_13 {dimension_numbers = #tpu.dot_dimension_numbers<[1], [0], [0], [1], [0, 0, 1, 1], [], []>} : vector<80x80xf32>, vector<80x32xf32>, vector<80x32xf32> -> vector<80x32xf32>
    %13 = vector.broadcast %10 : vector<1x32xf32> to vector<80x32xf32>
    %14 = arith.addf %12, %13 : vector<80x32xf32>
    %15 = math.tanh %14 : vector<80x32xf32>
    %c0_14 = arith.constant 0 : index
    %c0_15 = arith.constant 0 : index
    %16 = vector.load %arg6[%c0_14, %c0_15] : memref<32x32xf32, #tpu.memory_space<vmem>>, vector<32x32xf32>
    %c0_16 = arith.constant 0 : index
    %c0_17 = arith.constant 0 : index
    %17 = vector.load %arg7[%c0_16, %c0_17] : memref<1x32xf32, #tpu.memory_space<vmem>>, vector<1x32xf32>
    %cst_18 = arith.constant dense<0.000000e+00> : vector<80x32xf32>
    %18 = tpu.matmul %15, %16, %cst_18 {dimension_numbers = #tpu.dot_dimension_numbers<[1], [0], [0], [1], [0, 0, 1, 1], [], []>} : vector<80x32xf32>, vector<32x32xf32>, vector<80x32xf32> -> vector<80x32xf32>
    %cst_19 = arith.constant dense<0.000000e+00> : vector<80x32xf32>
    %19 = tpu.matmul %0, %18, %cst_19 {dimension_numbers = #tpu.dot_dimension_numbers<[1], [0], [0], [1], [0, 0, 1, 1], [], []>} : vector<80x80xf32>, vector<80x32xf32>, vector<80x32xf32> -> vector<80x32xf32>
    %20 = vector.broadcast %17 : vector<1x32xf32> to vector<80x32xf32>
    %21 = arith.addf %19, %20 : vector<80x32xf32>
    %22 = math.tanh %21 : vector<80x32xf32>
    %c0_20 = arith.constant 0 : index
    %c0_21 = arith.constant 0 : index
    %23 = vector.load %arg8[%c0_20, %c0_21] : memref<32x32xf32, #tpu.memory_space<vmem>>, vector<32x32xf32>
    %c0_22 = arith.constant 0 : index
    %c0_23 = arith.constant 0 : index
    %24 = vector.load %arg9[%c0_22, %c0_23] : memref<1x32xf32, #tpu.memory_space<vmem>>, vector<1x32xf32>
    %cst_24 = arith.constant dense<0.000000e+00> : vector<80x32xf32>
    %25 = tpu.matmul %22, %23, %cst_24 {dimension_numbers = #tpu.dot_dimension_numbers<[1], [0], [0], [1], [0, 0, 1, 1], [], []>} : vector<80x32xf32>, vector<32x32xf32>, vector<80x32xf32> -> vector<80x32xf32>
    %cst_25 = arith.constant dense<0.000000e+00> : vector<80x32xf32>
    %26 = tpu.matmul %0, %25, %cst_25 {dimension_numbers = #tpu.dot_dimension_numbers<[1], [0], [0], [1], [0, 0, 1, 1], [], []>} : vector<80x80xf32>, vector<80x32xf32>, vector<80x32xf32> -> vector<80x32xf32>
    %27 = vector.broadcast %24 : vector<1x32xf32> to vector<80x32xf32>
    %28 = arith.addf %26, %27 : vector<80x32xf32>
    %29 = math.tanh %28 : vector<80x32xf32>
    %30 = tpu.concatenate %8, %15, %22, %29 in 1 : vector<80x32xf32>, vector<80x32xf32>, vector<80x32xf32>, vector<80x32xf32> -> vector<80x128xf32>
    %c0_26 = arith.constant 0 : index
    %c0_27 = arith.constant 0 : index
    %31 = vector.load %arg10[%c0_26, %c0_27] : memref<80x128xf32, #tpu.memory_space<vmem>>, vector<80x128xf32>
    tpu.vector_store %arg10[%c0_26, %c0_27], %30 {strides = array<i32>} : memref<80x128xf32, #tpu.memory_space<vmem>>, vector<80x128xf32>,
    return
  }
}

module attributes {stable_mosaic.version = 11 : i64} {
  func.func @_head_kernel(%arg0: memref<60x128xf32, #tpu.memory_space<vmem>>, %arg1: memref<128x16xf32, #tpu.memory_space<vmem>>, %arg2: memref<1x16xf32, #tpu.memory_space<vmem>>, %arg3: memref<80x32xf32, #tpu.memory_space<vmem>>, %arg4: memref<1x32xf32, #tpu.memory_space<vmem>>, %arg5: memref<352x128xf32, #tpu.memory_space<vmem>>, %arg6: memref<1x128xf32, #tpu.memory_space<vmem>>, %arg7: memref<128x1xf32, #tpu.memory_space<vmem>>, %arg8: memref<1x1xf32, #tpu.memory_space<vmem>>, %arg9: memref<2x1xf32, #tpu.memory_space<vmem>>) attributes {dimension_semantics = [], scalar_prefetch = 0 : i64, scratch_operands = 0 : i64, tpu.core_type = #tpu.core_type<tc>} {
    %c0 = arith.constant 0 : index
    %c0_0 = arith.constant 0 : index
    %0 = vector.load %arg0[%c0, %c0_0] : memref<60x128xf32, #tpu.memory_space<vmem>>, vector<60x128xf32>
    %c0_1 = arith.constant 0 : index
    %c0_2 = arith.constant 0 : index
    %1 = vector.load %arg1[%c0_1, %c0_2] : memref<128x16xf32, #tpu.memory_space<vmem>>, vector<128x16xf32>
    %cst = arith.constant dense<0.000000e+00> : vector<60x16xf32>
    %2 = tpu.matmul %0, %1, %cst {dimension_numbers = #tpu.dot_dimension_numbers<[1], [0], [0], [1], [0, 0, 1, 1], [], []>} : vector<60x128xf32>, vector<128x16xf32>, vector<60x16xf32> -> vector<60x16xf32>
    %c0_3 = arith.constant 0 : index
    %c0_4 = arith.constant 0 : index
    %3 = vector.load %arg2[%c0_3, %c0_4] : memref<1x16xf32, #tpu.memory_space<vmem>>, vector<1x16xf32>
    %4 = vector.broadcast %3 : vector<1x16xf32> to vector<60x16xf32>
    %5 = arith.addf %2, %4 : vector<60x16xf32>
    %cst_5 = arith.constant 0.000000e+00 : f32
    %6 = vector.broadcast %cst_5 : f32 to vector<60x16xf32>
    %7 = arith.maximumf %5, %6 : vector<60x16xf32>
    %8 = vector.extract_strided_slice %7 {offsets = [0, 0], sizes = [30, 16], strides = [1, 1]} : vector<60x16xf32> to vector<30x16xf32>
    %9 = vector.extract_strided_slice %7 {offsets = [30, 0], sizes = [30, 16], strides = [1, 1]} : vector<60x16xf32> to vector<30x16xf32>
    %10 = arith.maximumf %8, %9 : vector<30x16xf32>
    %11 = vector.extract_strided_slice %10 {offsets = [0, 0], sizes = [22, 16], strides = [1, 1]} : vector<30x16xf32> to vector<22x16xf32>
    %12 = vector.extract_strided_slice %10 {offsets = [2, 0], sizes = [22, 16], strides = [1, 1]} : vector<30x16xf32> to vector<22x16xf32>
    %13 = vector.extract_strided_slice %10 {offsets = [4, 0], sizes = [22, 16], strides = [1, 1]} : vector<30x16xf32> to vector<22x16xf32>
    %14 = vector.extract_strided_slice %10 {offsets = [6, 0], sizes = [22, 16], strides = [1, 1]} : vector<30x16xf32> to vector<22x16xf32>
    %15 = vector.extract_strided_slice %10 {offsets = [8, 0], sizes = [22, 16], strides = [1, 1]} : vector<30x16xf32> to vector<22x16xf32>
    %16 = tpu.concatenate %11, %12, %13, %14, %15 in 1 : vector<22x16xf32>, vector<22x16xf32>, vector<22x16xf32>, vector<22x16xf32>, vector<22x16xf32> -> vector<22x80xf32>
    %c0_6 = arith.constant 0 : index
    %c0_7 = arith.constant 0 : index
    %17 = vector.load %arg3[%c0_6, %c0_7] : memref<80x32xf32, #tpu.memory_space<vmem>>, vector<80x32xf32>
    %cst_8 = arith.constant dense<0.000000e+00> : vector<22x32xf32>
    %18 = tpu.matmul %16, %17, %cst_8 {dimension_numbers = #tpu.dot_dimension_numbers<[1], [0], [0], [1], [0, 0, 1, 1], [], []>} : vector<22x80xf32>, vector<80x32xf32>, vector<22x32xf32> -> vector<22x32xf32>
    %c0_9 = arith.constant 0 : index
    %c0_10 = arith.constant 0 : index
    %19 = vector.load %arg4[%c0_9, %c0_10] : memref<1x32xf32, #tpu.memory_space<vmem>>, vector<1x32xf32>
    %20 = vector.broadcast %19 : vector<1x32xf32> to vector<22x32xf32>
    %21 = arith.addf %18, %20 : vector<22x32xf32>
    %cst_11 = arith.constant 0.000000e+00 : f32
    %22 = vector.broadcast %cst_11 : f32 to vector<22x32xf32>
    %23 = arith.maximumf %21, %22 : vector<22x32xf32>
    %24 = vector.extract_strided_slice %23 {offsets = [0, 0], sizes = [2, 32], strides = [1, 1]} : vector<22x32xf32> to vector<2x32xf32>
    %25 = vector.extract_strided_slice %23 {offsets = [2, 0], sizes = [2, 32], strides = [1, 1]} : vector<22x32xf32> to vector<2x32xf32>
    %26 = vector.extract_strided_slice %23 {offsets = [4, 0], sizes = [2, 32], strides = [1, 1]} : vector<22x32xf32> to vector<2x32xf32>
    %27 = vector.extract_strided_slice %23 {offsets = [6, 0], sizes = [2, 32], strides = [1, 1]} : vector<22x32xf32> to vector<2x32xf32>
    %28 = vector.extract_strided_slice %23 {offsets = [8, 0], sizes = [2, 32], strides = [1, 1]} : vector<22x32xf32> to vector<2x32xf32>
    %29 = vector.extract_strided_slice %23 {offsets = [10, 0], sizes = [2, 32], strides = [1, 1]} : vector<22x32xf32> to vector<2x32xf32>
    %30 = vector.extract_strided_slice %23 {offsets = [12, 0], sizes = [2, 32], strides = [1, 1]} : vector<22x32xf32> to vector<2x32xf32>
    %31 = vector.extract_strided_slice %23 {offsets = [14, 0], sizes = [2, 32], strides = [1, 1]} : vector<22x32xf32> to vector<2x32xf32>
    %32 = vector.extract_strided_slice %23 {offsets = [16, 0], sizes = [2, 32], strides = [1, 1]} : vector<22x32xf32> to vector<2x32xf32>
    %33 = vector.extract_strided_slice %23 {offsets = [18, 0], sizes = [2, 32], strides = [1, 1]} : vector<22x32xf32> to vector<2x32xf32>
    %34 = vector.extract_strided_slice %23 {offsets = [20, 0], sizes = [2, 32], strides = [1, 1]} : vector<22x32xf32> to vector<2x32xf32>
    %35 = tpu.concatenate %24, %25, %26, %27, %28, %29, %30, %31, %32, %33, %34 in 1 : vector<2x32xf32>, vector<2x32xf32>, vector<2x32xf32>, vector<2x32xf32>, vector<2x32xf32>, vector<2x32xf32>, vector<2x32xf32>, vector<2x32xf32>, vector<2x32xf32>, vector<2x32xf32>, vector<2x32xf32> -> vector<2x352xf32>
    %c0_12 = arith.constant 0 : index
    %c0_13 = arith.constant 0 : index
    %36 = vector.load %arg5[%c0_12, %c0_13] : memref<352x128xf32, #tpu.memory_space<vmem>>, vector<352x128xf32>
    %cst_14 = arith.constant dense<0.000000e+00> : vector<2x128xf32>
    %37 = tpu.matmul %35, %36, %cst_14 {dimension_numbers = #tpu.dot_dimension_numbers<[1], [0], [0], [1], [0, 0, 1, 1], [], []>} : vector<2x352xf32>, vector<352x128xf32>, vector<2x128xf32> -> vector<2x128xf32>
    %c0_15 = arith.constant 0 : index
    %c0_16 = arith.constant 0 : index
    %38 = vector.load %arg6[%c0_15, %c0_16] : memref<1x128xf32, #tpu.memory_space<vmem>>, vector<1x128xf32>
    %39 = vector.broadcast %38 : vector<1x128xf32> to vector<2x128xf32>
    %40 = arith.addf %37, %39 : vector<2x128xf32>
    %cst_17 = arith.constant 0.000000e+00 : f32
    %41 = vector.broadcast %cst_17 : f32 to vector<2x128xf32>
    %42 = arith.maximumf %40, %41 : vector<2x128xf32>
    %c0_18 = arith.constant 0 : index
    %c0_19 = arith.constant 0 : index
    %43 = vector.load %arg7[%c0_18, %c0_19] : memref<128x1xf32, #tpu.memory_space<vmem>>, vector<128x1xf32>
    %cst_20 = arith.constant dense<0.000000e+00> : vector<2x1xf32>
    %44 = tpu.matmul %42, %43, %cst_20 {dimension_numbers = #tpu.dot_dimension_numbers<[1], [0], [0], [1], [0, 0, 1, 1], [], []>} : vector<2x128xf32>, vector<128x1xf32>, vector<2x1xf32> -> vector<2x1xf32>
    %c0_21 = arith.constant 0 : index
    %c0_22 = arith.constant 0 : index
    %45 = vector.load %arg8[%c0_21, %c0_22] : memref<1x1xf32, #tpu.memory_space<vmem>>, vector<1x1xf32>
    %46 = vector.broadcast %45 : vector<1x1xf32> to vector<2x1xf32>
    %47 = arith.addf %44, %46 : vector<2x1xf32>
    %c0_23 = arith.constant 0 : index
    %c0_24 = arith.constant 0 : index
    %48 = vector.load %arg9[%c0_23, %c0_24] : memref<2x1xf32, #tpu.memory_space<vmem>>, vector<2x1xf32>
    tpu.vector_store %arg9[%c0_23, %c0_24], %47 {strides = array<i32>} : memref<2x1xf32, #tpu.memory_space<vmem>>, vector<2x1xf32>,
    return
  }
}

</mosaic_0001>

<bundles_post_ra>
// kernel: dgcnn_forward.2
= control target key start
LH: loop header
LB: loop body
LE: loop exit
PB: predicated region body
PF: predicated region fallthrough
CT: control target
= control target key end

     0   :  { %vm60_vm0 = vcmask 261120   ;;  %vm212_vm1 = vcmask 654336   ;;  %vm1321_vm2 = vcmask 523264   ;;  %vm1332_vm3 = vcmask 785408   ;;  %s2452_s2 = inlined_call_operand.vmem [shape: f32[32,32], index: 2, kind: input, shape index: {}]   ;;  %s2453_s1 = inlined_call_operand.vmem [shape: f32[80,32], index: 1, kind: input, shape index: {}]   ;;  %s2454_s0 = inlined_call_operand.vmem [shape: f32[80,80], index: 0, kind: input, shape index: {}]   ;;  %s2455_s4 = inlined_call_operand.vmem [shape: f32[32,32], index: 4, kind: input, shape index: {}]   ;;  %s2456_s3 = inlined_call_operand.vmem [shape: f32[1,32], index: 3, kind: input, shape index: {}]   ;;  %s2457_s6 = inlined_call_operand.vmem [shape: f32[32,32], index: 6, kind: input, shape index: {}]   ;;  %s2458_s5 = inlined_call_operand.vmem [shape: f32[1,32], index: 5, kind: input, shape index: {}]   ;;  %s2459_s8 = inlined_call_operand.vmem [shape: f32[32,32], index: 8, kind: input, shape index: {}]   ;;  %s2460_s7 = inlined_call_operand.vmem [shape: f32[1,32], index: 7, kind: input, shape index: {}]   ;;  %s2461_s9 = inlined_call_operand.vmem [shape: f32[1,32], index: 9, kind: input, shape index: {}]   ;;  %s2462_s10 = inlined_call_operand.vmem [shape: f32[80,128], index: 10, kind: output, shape index: {}]  }
   0x1   :  { %v55_v0 = vld [vmem:[%s2452_s2] sm:$0xff]  ;;  %v56_v1 = vld [vmem:[%s2452_s2 + $0x8] sm:$0xff]  ;;  %v57_v2 = vld [vmem:[%s2452_s2 + $0x10] sm:$0xff] }
   0x2   :  { %v1809_v3 = vpack.c.bf16 %v56_v1, %v55_v0  ;;  %v58_v4 = vld [vmem:[%s2452_s2 + $0x18] sm:$0xff]  ;;  %v45_v5 = vld [vmem:[%s2453_s1] sm:$0xff]  ;;  %v46_v7 = vld [vmem:[%s2453_s1 + $0x8] sm:$0xff] }
   0x3   :  { %v1813_v6 = vpack.c.bf16 %v58_v4, %v57_v2  ;;  %1585 = vmatprep.mubr.msk.f32.mxu0 %vm60_vm0, %v45_v5  ;;  %v47_v8 = vld [vmem:[%s2453_s1 + $0x10] sm:$0xff]  ;;  %v48_v9 = vld [vmem:[%s2453_s1 + $0x18] sm:$0xff]  ;;  %v49_v10 = vld [vmem:[%s2453_s1 + $0x20] sm:$0xff] }
   0x4   :  { %1810 = vmatprep.subr.bf16.mxu0 %v1809_v3  ;;  %v50_v11 = vld [vmem:[%s2453_s1 + $0x28] sm:$0xff]  ;;  %v51_v12 = vld [vmem:[%s2453_s1 + $0x30] sm:$0xff]  ;;  %v52_v13 = vld [vmem:[%s2453_s1 + $0x38] sm:$0xff] }
   0x5   :  { %1812 = vmatpush3.bf16.msra.mxu0 %v1809_v3  ;;  %v53_v14 = vld [vmem:[%s2453_s1 + $0x40] sm:$0xff]  ;;  %v54_v15 = vld [vmem:[%s2453_s1 + $0x48] sm:$0xff]  ;;  %v2145_v36 = vld [vmem:[%s2454_s0 + $0x10] sm:$0xff] }
   0x6   :  { %1814 = vmatprep.subr.bf16.mxu0 %v1813_v6  ;;  %v2127_v16 = vld [vmem:[%s2454_s0] sm:$0xff]  ;;  %v369_v18 = vld [vmem:[%s2455_s4 + $0x8] sm:$0xff]  ;;  %v2154_v37 = vld [vmem:[%s2454_s0 + $0x18] sm:$0xff] }
   0x7   :  { %1620 = vmatprep.mubr.msk.f32.mxu1 %vm212_vm1, %v2127_v16  ;;  %v368_v17 = vld [vmem:[%s2455_s4] sm:$0xff]  ;;  %v2140_v35 = vld [vmem:[%s2454_s0 + $0x8] sm:$0xff]  ;;  %v2173_v40 = vld [vmem:[%s2454_s0 + $0x30] sm:$0xff] }
   0x8   :  { %v1837_v19 = vpack.c.bf16 %v369_v18, %v368_v17  ;;  %v2159_v38 = vld [vmem:[%s2454_s0 + $0x20] sm:$0xff]  ;;  %v2168_v39 = vld [vmem:[%s2454_s0 + $0x28] sm:$0xff]  ;;  %v2182_v41 = vld [vmem:[%s2454_s0 + $0x38] sm:$0xff] }
   0x9   :  { %1816 = vmatpush3.bf16.msra.mxu0 %v1813_v6  ;;  %v2187_v42 = vld [vmem:[%s2454_s0 + $0x40] sm:$0xff]  ;;  %v2196_v43 = vld [vmem:[%s2454_s0 + $0x48] sm:$0xff]  ;;  %v370_v44 = vld [vmem:[%s2455_s4 + $0x10] sm:$0xff] }
   0xa   :  { %1838 = vmatprep.subr.bf16.mxu0 %v1837_v19  ;;  %v371_v45 = vld [vmem:[%s2455_s4 + $0x18] sm:$0xff]  ;;  %v1367_v47 = vld [vmem:[%s2456_s3] ss:$0 sm:$0xff] }
   0xb   :  { %v1841_v46 = vpack.c.bf16 %v371_v45, %v370_v44  ;;  %v1388_v45 = vld [vmem:[%s2458_s5] ss:$0 sm:$0xff]  ;;  %s2014_s5 = smov 32  }
   0xc   :  { %1586 = vmatmul.mubr.msk.f32.vlgmr.msra.gmra.mrb[0].mxu0 %vm60_vm0, %v46_v7 }
   0xd   :  { %1588 = vmatprep.mubr.msk.f32.mxu0 %vm60_vm0, %v47_v8  ;;  %1840 = vmatpush3.bf16.msra.mxu0 %v1837_v19 }
   0xe   :  { %1842 = vmatprep.subr.bf16.mxu0 %v1841_v46 }
  0x10   :  { %1589 = vmatmul.mubr.msk.f32.gmra.mrb[2].mxu0 %vm60_vm0, %v48_v9 }
  0x11   :  { %1591 = vmatprep.mubr.msk.f32.mxu0 %vm60_vm0, %v49_v10  ;;  %1844 = vmatpush3.bf16.msra.mxu0 %v1841_v46 }
  0x14   :  { %1592 = vmatmul.mubr.msk.f32.gmra.mrb[4].mxu0 %vm60_vm0, %v50_v11 }
  0x15   :  { %1594 = vmatprep.mubr.msk.f32.mxu0 %vm60_vm0, %v51_v12 }
  0x18   :  { %1595 = vmatmul.mubr.msk.f32.gmra.mrb[6].mxu0 %vm60_vm0, %v52_v13 }
  0x19   :  { %1597 = vmatprep.mubr.msk.f32.mxu0 %vm60_vm0, %v53_v14  ;;  %v649_v14 = vld [vmem:[%s2457_s6] sm:$0xff] }
  0x1c   :  { %1598 = vmatmul.mubr.msk.f32.gmra.mrb[8].mxu0 %vm60_vm0, %v54_v15  ;;  %v650_v15 = vld [vmem:[%s2457_s6 + $0x8] sm:$0xff] }
  0x1d   :  { %v1865_v17 = vpack.c.bf16 %v650_v15, %v649_v14 }
  0x1f   :  { %1866 = vmatprep.subr.bf16.mxu0 %v1865_v17 }
  0xdf   :  { %v1587_v20 = vpop.f32.mrb[0].mxu0 }
  0xe0   :  { %v157_v21 = vpop.f32.mrb[1].mxu0 }
  0xe1   :  { %v1817_v22 = vpack.c.bf16 %v1587_v20, %v157_v21 }
  0xe3   :  { %v1590_v23 = vpop.f32.mrb[2].mxu0  ;;  %1818 = vmatprep.subr.bf16.mxu1 %v1817_v22 }
  0xe4   :  { %v167_v24 = vpop.f32.mrb[3].mxu0  ;;  %1820 = vmatpush3.bf16.msra.mxu1 %v1817_v22 }
  0xe5   :  { %v1821_v25 = vpack.c.bf16 %v1590_v23, %v167_v24 }
  0xe7   :  { %v1593_v26 = vpop.f32.mrb[4].mxu0  ;;  %1822 = vmatprep.subr.bf16.mxu1 %v1821_v25 }
  0xe8   :  { %v177_v27 = vpop.f32.mrb[5].mxu0  ;;  %1824 = vmatpush3.bf16.msra.mxu1 %v1821_v25 }
  0xe9   :  { %v1825_v28 = vpack.c.bf16 %v1593_v26, %v177_v27 }
  0xeb   :  { %v1596_v29 = vpop.f32.mrb[6].mxu0  ;;  %1826 = vmatprep.subr.bf16.mxu1 %v1825_v28 }
  0xec   :  { %v187_v30 = vpop.f32.mrb[7].mxu0  ;;  %1828 = vmatpush3.bf16.msra.mxu1 %v1825_v28 }
  0xed   :  { %v1829_v31 = vpack.c.bf16 %v1596_v29, %v187_v30 }
  0xef   :  { %v1599_v32 = vpop.f32.mrb[8].mxu0  ;;  %1830 = vmatprep.subr.bf16.mxu1 %v1829_v31 }
  0xf0   :  { %v197_v33 = vpop.f32.mrb[9].mxu0  ;;  %1832 = vmatpush3.bf16.msra.mxu1 %v1829_v31 }
  0xf1   :  { %v1833_v34 = vpack.c.bf16 %v1599_v32, %v197_v33  ;;  %v651_v33 = vld [vmem:[%s2457_s6 + $0x10] sm:$0xff] }
  0xf3   :  { %1834 = vmatprep.subr.bf16.mxu1 %v1833_v34 }
  0xf4   :  { %1836 = vmatpush3.bf16.msra.mxu1 %v1833_v34  ;;  %v652_v34 = vld [vmem:[%s2457_s6 + $0x18] sm:$0xff] }
  0xf5   :  { %v1869_v44 = vpack.c.bf16 %v652_v34, %v651_v33 }
  0xf7   :  { %1621 = vmatmul.mubr.msk.f32.vlgmr.msra.gmra.mrb[0].mxu1 %vm212_vm1, %v2140_v35 }
  0xf8   :  { %1623 = vmatprep.mubr.msk.f32.mxu1 %vm212_vm1, %v2145_v36 }
  0xfb   :  { %1624 = vmatmul.mubr.msk.f32.gmra.mrb[2].mxu1 %vm212_vm1, %v2154_v37 }
  0xfc   :  { %1626 = vmatprep.mubr.msk.f32.mxu1 %vm212_vm1, %v2159_v38 }
  0xff   :  { %1627 = vmatmul.mubr.msk.f32.gmra.mrb[4].mxu1 %vm212_vm1, %v2168_v39 }
 0x100   :  { %1629 = vmatprep.mubr.msk.f32.mxu1 %vm212_vm1, %v2173_v40 }
 0x103   :  { %1630 = vmatmul.mubr.msk.f32.gmra.mrb[6].mxu1 %vm212_vm1, %v2182_v41 }
 0x104   :  { %1632 = vmatprep.mubr.msk.f32.mxu1 %vm212_vm1, %v2187_v42 }
 0x107   :  { %1633 = vmatmul.mubr.msk.f32.gmra.mrb[8].mxu1 %vm212_vm1, %v2196_v43 }
 0x108   :  { %1678 = vmatprep.mubr.msk.f32.mxu1 %vm212_vm1, %v2127_v16 }
 0x1ca   :  { %v1622_v48 = vpop.f32.mrb[0].mxu1 }
 0x1cb   :  { %v315_v49 = vadd.f32 %v1622_v48, %v1367_v47  ;;  %v309_v50 = vpop.f32.mrb[1].mxu1 }
 0x1cc   :  { %v310_v51 = vadd.f32 %v1367_v47, %v309_v50 }
 0x1ce   :  { %1934 = vtanh.f32 %v310_v51  ;;  %v1625_v52 = vpop.f32.mrb[2].mxu1 }
 0x1cf   :  { %1936 = vtanh.f32 %v315_v49  ;;  %v325_v53 = vadd.f32 %v1625_v52, %v1367_v47  ;;  %v319_v54 = vpop.f32.mrb[3].mxu1 }
 0x1d0   :  { %v320_v55 = vadd.f32 %v1367_v47, %v319_v54 }
 0x1d2   :  { %1938 = vtanh.f32 %v320_v55  ;;  %v1628_v56 = vpop.f32.mrb[4].mxu1 }
 0x1d3   :  { %1940 = vtanh.f32 %v325_v53  ;;  %v335_v57 = vadd.f32 %v1628_v56, %v1367_v47  ;;  %v329_v58 = vpop.f32.mrb[5].mxu1 }
 0x1d4   :  { %v330_v59 = vadd.f32 %v1367_v47, %v329_v58 }
 0x1d6   :  { %1942 = vtanh.f32 %v330_v59  ;;  %v1631_v60 = vpop.f32.mrb[6].mxu1 }
 0x1d7   :  { %1944 = vtanh.f32 %v335_v57  ;;  %v345_v61 = vadd.f32 %v1631_v60, %v1367_v47  ;;  %v339_v62 = vpop.f32.mrb[7].mxu1 }
 0x1d8   :  { %v2211_v63 = vpop.eup %1934  ;;  %v340_v0 = vadd.f32 %v1367_v47, %v339_v62 }
 0x1d9   :  { %v2213_v1 = vpop.eup %1936  ;;  %1643 = vmatprep.mubr.msk.f32.mxu0 %vm60_vm0, %v2211_v63 }
 0x1da   :  { %1946 = vtanh.f32 %v340_v0  ;;  %v1634_v2 = vpop.f32.mrb[8].mxu1  ;;  %1644 = vmatmul.mubr.msk.f32.vlgmr.msra.gmra.mrb[10].mxu0 %vm60_vm0, %v2213_v1 }
 0x1db   :  { %1948 = vtanh.f32 %v345_v61  ;;  %v355_v3 = vadd.f32 %v1634_v2, %v1367_v47  ;;  %v349_v4 = vpop.f32.mrb[9].mxu1  ;;  %1868 = vmatpush3.bf16.msra.mxu0 %v1865_v17 }
 0x1dc   :  { %v2219_v5 = vpop.eup %1938  ;;  %v350_v6 = vadd.f32 %v1367_v47, %v349_v4  ;;  %1870 = vmatprep.subr.bf16.mxu0 %v1869_v44 }
 0x1dd   :  { %v2221_v7 = vpop.eup %1940  ;;  %1646 = vmatprep.mubr.msk.f32.mxu0 %vm60_vm0, %v2219_v5 }
 0x1de   :  { %1950 = vtanh.f32 %v350_v6  ;;  %1647 = vmatmul.mubr.msk.f32.gmra.mrb[12].mxu0 %vm60_vm0, %v2221_v7 }
 0x1df   :  { %1952 = vtanh.f32 %v355_v3  ;;  %1872 = vmatpush3.bf16.msra.mxu0 %v1869_v44 }
 0x1e0   :  { %v2227_v8 = vpop.eup %1942 }
 0x1e1   :  { %v2229_v9 = vpop.eup %1944  ;;  %1649 = vmatprep.mubr.msk.f32.mxu0 %vm60_vm0, %v2227_v8 }
 0x1e2   :  { %1650 = vmatmul.mubr.msk.f32.gmra.mrb[14].mxu0 %vm60_vm0, %v2229_v9 }
 0x1e4   :  { %v2235_v10 = vpop.eup %1946 }
 0x1e5   :  { %v2237_v11 = vpop.eup %1948  ;;  %1652 = vmatprep.mubr.msk.f32.mxu0 %vm60_vm0, %v2235_v10 }
 0x1e6   :  { %1653 = vmatmul.mubr.msk.f32.gmra.mrb[16].mxu0 %vm60_vm0, %v2237_v11 }
 0x1e8   :  { %v2243_v12 = vpop.eup %1950 }
 0x1e9   :  { %v2245_v13 = vpop.eup %1952  ;;  %1655 = vmatprep.mubr.msk.f32.mxu0 %vm60_vm0, %v2243_v12 }
 0x1ea   :  { %1656 = vmatmul.mubr.msk.f32.gmra.mrb[18].mxu0 %vm60_vm0, %v2245_v13 }
 0x2ad   :  { %v1645_v18 = vpop.f32.mrb[10].mxu0 }
 0x2ae   :  { %v469_v19 = vpop.f32.mrb[11].mxu0 }
 0x2af   :  { %v1845_v20 = vpack.c.bf16 %v1645_v18, %v469_v19 }
 0x2b1   :  { %v1648_v21 = vpop.f32.mrb[12].mxu0  ;;  %1846 = vmatprep.subr.bf16.mxu1 %v1845_v20 }
 0x2b2   :  { %v479_v22 = vpop.f32.mrb[13].mxu0  ;;  %1848 = vmatpush3.bf16.msra.mxu1 %v1845_v20 }
 0x2b3   :  { %v1849_v23 = vpack.c.bf16 %v1648_v21, %v479_v22 }
 0x2b5   :  { %v1651_v24 = vpop.f32.mrb[14].mxu0  ;;  %1850 = vmatprep.subr.bf16.mxu1 %v1849_v23 }
 0x2b6   :  { %v489_v25 = vpop.f32.mrb[15].mxu0  ;;  %1852 = vmatpush3.bf16.msra.mxu1 %v1849_v23  ;;  %v930_v23 = vld [vmem:[%s2459_s8] sm:$0xff] }
 0x2b7   :  { %v1853_v26 = vpack.c.bf16 %v1651_v24, %v489_v25  ;;  %v931_v24 = vld [vmem:[%s2459_s8 + $0x8] sm:$0xff] }
 0x2b8   :  { %v1893_v25 = vpack.c.bf16 %v931_v24, %v930_v23 }
 0x2b9   :  { %v1654_v27 = vpop.f32.mrb[16].mxu0  ;;  %1854 = vmatprep.subr.bf16.mxu1 %v1853_v26 }
 0x2ba   :  { %v499_v28 = vpop.f32.mrb[17].mxu0  ;;  %1856 = vmatpush3.bf16.msra.mxu1 %v1853_v26  ;;  %1894 = vmatprep.subr.bf16.mxu0 %v1893_v25 }
 0x2bb   :  { %v1857_v29 = vpack.c.bf16 %v1654_v27, %v499_v28 }
 0x2bd   :  { %v1657_v30 = vpop.f32.mrb[18].mxu0  ;;  %1858 = vmatprep.subr.bf16.mxu1 %v1857_v29 }
 0x2be   :  { %v509_v31 = vpop.f32.mrb[19].mxu0  ;;  %1860 = vmatpush3.bf16.msra.mxu1 %v1857_v29 }
 0x2bf   :  { %v1861_v32 = vpack.c.bf16 %v1657_v30, %v509_v31 }
 0x2c1   :  { %1862 = vmatprep.subr.bf16.mxu1 %v1861_v32 }
 0x2c2   :  { %1864 = vmatpush3.bf16.msra.mxu1 %v1861_v32 }
 0x2c5   :  { %1679 = vmatmul.mubr.msk.f32.vlgmr.msra.gmra.mrb[10].mxu1 %vm212_vm1, %v2140_v35 }
 0x2c6   :  { %1681 = vmatprep.mubr.msk.f32.mxu1 %vm212_vm1, %v2145_v36 }
 0x2c9   :  { %1682 = vmatmul.mubr.msk.f32.gmra.mrb[12].mxu1 %vm212_vm1, %v2154_v37 }
 0x2ca   :  { %1684 = vmatprep.mubr.msk.f32.mxu1 %vm212_vm1, %v2159_v38 }
 0x2cd   :  { %1685 = vmatmul.mubr.msk.f32.gmra.mrb[14].mxu1 %vm212_vm1, %v2168_v39 }
 0x2ce   :  { %1687 = vmatprep.mubr.msk.f32.mxu1 %vm212_vm1, %v2173_v40 }
 0x2d1   :  { %1688 = vmatmul.mubr.msk.f32.gmra.mrb[16].mxu1 %vm212_vm1, %v2182_v41 }
 0x2d2   :  { %1690 = vmatprep.mubr.msk.f32.mxu1 %vm212_vm1, %v2187_v42 }
 0x2d5   :  { %1691 = vmatmul.mubr.msk.f32.gmra.mrb[18].mxu1 %vm212_vm1, %v2196_v43 }
 0x2d6   :  { %1736 = vmatprep.mubr.msk.f32.mxu1 %vm212_vm1, %v2127_v16 }
 0x398   :  { %v1680_v46 = vpop.f32.mrb[10].mxu1 }
 0x399   :  { %v596_v47 = vadd.f32 %v1680_v46, %v1388_v45  ;;  %v590_v48 = vpop.f32.mrb[11].mxu1 }
 0x39a   :  { %v591_v49 = vadd.f32 %v1388_v45, %v590_v48 }
 0x39b   :  { %1954 = vtanh.f32 %v596_v47 }
 0x39c   :  { %1956 = vtanh.f32 %v591_v49  ;;  %v1683_v50 = vpop.f32.mrb[12].mxu1 }
 0x39d   :  { %v606_v51 = vadd.f32 %v1683_v50, %v1388_v45  ;;  %v600_v52 = vpop.f32.mrb[13].mxu1  ;;  %v932_v50 = vld [vmem:[%s2459_s8 + $0x10] sm:$0xff] }
 0x39e   :  { %v601_v53 = vadd.f32 %v1388_v45, %v600_v52 }
 0x39f   :  { %1958 = vtanh.f32 %v606_v51  ;;  %v933_v51 = vld [vmem:[%s2459_s8 + $0x18] sm:$0xff] }
 0x3a0   :  { %1960 = vtanh.f32 %v601_v53  ;;  %v1686_v54 = vpop.f32.mrb[14].mxu1  ;;  %v1897_v52 = vpack.c.bf16 %v933_v51, %v932_v50  ;;  %v1409_v53 = vld [vmem:[%s2460_s7] ss:$0 sm:$0xff]  ;;  %s2015_s7 = smov 64  }
 0x3a1   :  { %v616_v55 = vadd.f32 %v1686_v54, %v1388_v45  ;;  %v610_v56 = vpop.f32.mrb[15].mxu1 }
 0x3a2   :  { %v611_v57 = vadd.f32 %v1388_v45, %v610_v56 }
 0x3a4   :  { %1962 = vtanh.f32 %v611_v57  ;;  %v1689_v58 = vpop.f32.mrb[16].mxu1 }
 0x3a5   :  { %v1955_v59 = vpop.eup %1954  ;;  %1964 = vtanh.f32 %v616_v55  ;;  %v626_v60 = vadd.f32 %v1689_v58, %v1388_v45  ;;  %v620_v61 = vpop.f32.mrb[17].mxu1 }
 0x3a6   :  { %v1957_v62 = vpop.eup %1956  ;;  %v621_v0 = vadd.f32 %v1388_v45, %v620_v61  ;;  %1213 = vrot.lane.b32.xlu0 %v1955_v59, %s2014_s5 }
 0x3a7   :  { %1701 = vmatprep.mubr.msk.f32.mxu0 %vm60_vm0, %v1957_v62 }
 0x3a8   :  { %1966 = vtanh.f32 %v621_v0  ;;  %v1692_v2 = vpop.f32.mrb[18].mxu1  ;;  %1702 = vmatmul.mubr.msk.f32.vlgmr.msra.gmra.mrb[20].mxu0 %vm60_vm0, %v1955_v59 }
 0x3a9   :  { %v1959_v3 = vpop.eup %1958  ;;  %1968 = vtanh.f32 %v626_v60  ;;  %v636_v4 = vadd.f32 %v1692_v2, %v1388_v45  ;;  %v630_v6 = vpop.f32.mrb[19].mxu1  ;;  %1896 = vmatpush3.bf16.msra.mxu0 %v1893_v25 }
 0x3aa   :  { %v1961_v14 = vpop.eup %1960  ;;  %v631_v15 = vadd.f32 %v1388_v45, %v630_v6  ;;  %1217 = vrot.lane.b32.xlu1 %v1959_v3, %s2014_s5  ;;  %1211 = vrot.lane.b32.xlu0 %v1957_v62, %s2014_s5 }
 0x3ab   :  { %1704 = vmatprep.mubr.msk.f32.mxu0 %vm60_vm0, %v1961_v14  ;;  %1898 = vmatprep.subr.bf16.mxu0 %v1897_v52 }
 0x3ac   :  { %1970 = vtanh.f32 %v631_v15  ;;  %1705 = vmatmul.mubr.msk.f32.gmra.mrb[22].mxu0 %vm60_vm0, %v1959_v3 }
 0x3ad   :  { %1972 = vtanh.f32 %v636_v4  ;;  %1900 = vmatpush3.bf16.msra.mxu0 %v1897_v52 }
 0x3ae   :  { %v1963_v17 = vpop.eup %1962  ;;  %1215 = vrot.lane.b32.xlu1 %v1961_v14, %s2014_s5 }
 0x3af   :  { %v1965_v18 = vpop.eup %1964  ;;  %1219 = vrot.lane.b32.xlu0 %v1963_v17, %s2014_s5  ;;  %1707 = vmatprep.mubr.msk.f32.mxu0 %vm60_vm0, %v1963_v17 }
 0x3b0   :  { %1708 = vmatmul.mubr.msk.f32.gmra.mrb[24].mxu0 %vm60_vm0, %v1965_v18 }
 0x3b2   :  { %v1967_v19 = vpop.eup %1966  ;;  %1221 = vrot.lane.b32.xlu1 %v1965_v18, %s2014_s5 }
 0x3b3   :  { %v1969_v20 = vpop.eup %1968  ;;  %1223 = vrot.lane.b32.xlu0 %v1967_v19, %s2014_s5  ;;  %1710 = vmatprep.mubr.msk.f32.mxu0 %vm60_vm0, %v1967_v19 }
 0x3b4   :  { %1711 = vmatmul.mubr.msk.f32.gmra.mrb[26].mxu0 %vm60_vm0, %v1969_v20 }
 0x3b6   :  { %v1971_v21 = vpop.eup %1970  ;;  %1225 = vrot.lane.b32.xlu1 %v1969_v20, %s2014_s5 }
 0x3b7   :  { %v1973_v22 = vpop.eup %1972  ;;  %1227 = vrot.lane.b32.xlu0 %v1971_v21, %s2014_s5  ;;  %1713 = vmatprep.mubr.msk.f32.mxu0 %vm60_vm0, %v1971_v21 }
 0x3b8   :  { %1714 = vmatmul.mubr.msk.f32.gmra.mrb[28].mxu0 %vm60_vm0, %v1973_v22 }
 0x3ba   :  { %1229 = vrot.lane.b32.xlu1 %v1973_v22, %s2014_s5 }
 0x47b   :  { %v1703_v26 = vpop.f32.mrb[20].mxu0 }
 0x47c   :  { %v750_v27 = vpop.f32.mrb[21].mxu0 }
 0x47d   :  { %v1873_v28 = vpack.c.bf16 %v1703_v26, %v750_v27 }
 0x47f   :  { %v1706_v29 = vpop.f32.mrb[22].mxu0  ;;  %1874 = vmatprep.subr.bf16.mxu1 %v1873_v28 }
 0x480   :  { %v760_v30 = vpop.f32.mrb[23].mxu0  ;;  %1876 = vmatpush3.bf16.msra.mxu1 %v1873_v28 }
 0x481   :  { %v1877_v31 = vpack.c.bf16 %v1706_v29, %v760_v30 }
 0x483   :  { %v1709_v32 = vpop.f32.mrb[24].mxu0  ;;  %1878 = vmatprep.subr.bf16.mxu1 %v1877_v31 }
 0x484   :  { %v770_v33 = vpop.f32.mrb[25].mxu0  ;;  %1880 = vmatpush3.bf16.msra.mxu1 %v1877_v31 }
 0x485   :  { %v1881_v34 = vpack.c.bf16 %v1709_v32, %v770_v33 }
 0x487   :  { %v1712_v44 = vpop.f32.mrb[26].mxu0  ;;  %1882 = vmatprep.subr.bf16.mxu1 %v1881_v34 }
 0x488   :  { %v780_v45 = vpop.f32.mrb[27].mxu0  ;;  %1884 = vmatpush3.bf16.msra.mxu1 %v1881_v34 }
 0x489   :  { %v1885_v46 = vpack.c.bf16 %v1712_v44, %v780_v45 }
 0x48b   :  { %v1715_v47 = vpop.f32.mrb[28].mxu0  ;;  %1886 = vmatprep.subr.bf16.mxu1 %v1885_v46 }
 0x48c   :  { %v790_v48 = vpop.f32.mrb[29].mxu0  ;;  %1888 = vmatpush3.bf16.msra.mxu1 %v1885_v46 }
 0x48d   :  { %v1889_v49 = vpack.c.bf16 %v1715_v47, %v790_v48 }
 0x48f   :  { %1890 = vmatprep.subr.bf16.mxu1 %v1889_v49 }
 0x490   :  { %1892 = vmatpush3.bf16.msra.mxu1 %v1889_v49 }
 0x493   :  { %1737 = vmatmul.mubr.msk.f32.vlgmr.msra.gmra.mrb[20].mxu1 %vm212_vm1, %v2140_v35 }
 0x494   :  { %1739 = vmatprep.mubr.msk.f32.mxu1 %vm212_vm1, %v2145_v36 }
 0x497   :  { %1740 = vmatmul.mubr.msk.f32.gmra.mrb[22].mxu1 %vm212_vm1, %v2154_v37 }
 0x498   :  { %1742 = vmatprep.mubr.msk.f32.mxu1 %vm212_vm1, %v2159_v38 }
 0x49b   :  { %1743 = vmatmul.mubr.msk.f32.gmra.mrb[24].mxu1 %vm212_vm1, %v2168_v39 }
 0x49c   :  { %1745 = vmatprep.mubr.msk.f32.mxu1 %vm212_vm1, %v2173_v40 }
 0x49f   :  { %1746 = vmatmul.mubr.msk.f32.gmra.mrb[26].mxu1 %vm212_vm1, %v2182_v41 }
 0x4a0   :  { %1748 = vmatprep.mubr.msk.f32.mxu1 %vm212_vm1, %v2187_v42 }
 0x4a3   :  { %1749 = vmatmul.mubr.msk.f32.gmra.mrb[28].mxu1 %vm212_vm1, %v2196_v43 }
 0x4a4   :  { %1797 = vmatprep.mubr.msk.f32.mxu1 %vm212_vm1, %v2145_v36 }
 0x566   :  { %v1738_v54 = vpop.f32.mrb[20].mxu1 }
 0x567   :  { %v877_v55 = vadd.f32 %v1738_v54, %v1409_v53  ;;  %v871_v56 = vpop.f32.mrb[21].mxu1 }
 0x568   :  { %v872_v57 = vadd.f32 %v1409_v53, %v871_v56 }
 0x569   :  { %1974 = vtanh.f32 %v877_v55 }
 0x56a   :  { %1976 = vtanh.f32 %v872_v57  ;;  %v1741_v36 = vpop.f32.mrb[22].mxu1 }
 0x56b   :  { %v887_v58 = vadd.f32 %v1741_v36, %v1409_v53  ;;  %v881_v59 = vpop.f32.mrb[23].mxu1 }
 0x56c   :  { %v882_v60 = vadd.f32 %v1409_v53, %v881_v59 }
 0x56d   :  { %1978 = vtanh.f32 %v887_v58 }
 0x56e   :  { %1980 = vtanh.f32 %v882_v60  ;;  %v1744_v61 = vpop.f32.mrb[24].mxu1 }
 0x56f   :  { %v897_v62 = vadd.f32 %v1744_v61, %v1409_v53  ;;  %v891_v0 = vpop.f32.mrb[25].mxu1 }
 0x570   :  { %v892_v2 = vadd.f32 %v1409_v53, %v891_v0 }
 0x571   :  { %1982 = vtanh.f32 %v897_v62 }
 0x572   :  { %1984 = vtanh.f32 %v892_v2  ;;  %v1747_v3 = vpop.f32.mrb[26].mxu1 }
 0x573   :  { %v1975_v4 = vpop.eup %1974  ;;  %v907_v6 = vadd.f32 %v1747_v3, %v1409_v53  ;;  %v901_v14 = vpop.f32.mrb[27].mxu1 }
 0x574   :  { %v1977_v15 = vpop.eup %1976  ;;  %v902_v17 = vadd.f32 %v1409_v53, %v901_v14  ;;  %1243 = vrot.lane.b32.xlu1 %v1975_v4, %s2015_s7 }
 0x575   :  { %1986 = vtanh.f32 %v907_v6  ;;  %1241 = vrot.lane.b32.xlu0 %v1977_v15, %s2015_s7  ;;  %1759 = vmatprep.mubr.msk.f32.mxu0 %vm60_vm0, %v1977_v15 }
 0x576   :  { %1988 = vtanh.f32 %v902_v17  ;;  %v1750_v18 = vpop.f32.mrb[28].mxu1  ;;  %1760 = vmatmul.mubr.msk.f32.vlgmr.msra.gmra.mrb[30].mxu0 %vm60_vm0, %v1975_v4 }
 0x577   :  { %v1979_v19 = vpop.eup %1978  ;;  %v917_v20 = vadd.f32 %v1750_v18, %v1409_v53  ;;  %v911_v21 = vpop.f32.mrb[29].mxu1 }
 0x578   :  { %v1981_v22 = vpop.eup %1980  ;;  %v912_v23 = vadd.f32 %v1409_v53, %v911_v21  ;;  %1247 = vrot.lane.b32.xlu1 %v1979_v19, %s2015_s7 }
 0x579   :  { %1990 = vtanh.f32 %v917_v20  ;;  %1245 = vrot.lane.b32.xlu0 %v1981_v22, %s2015_s7  ;;  %1762 = vmatprep.mubr.msk.f32.mxu0 %vm60_vm0, %v1981_v22  ;;  %v1218_v22 = vpop.permute.xlu1 %1217 }
 0x57a   :  { %1992 = vtanh.f32 %v912_v23  ;;  %1763 = vmatmul.mubr.msk.f32.gmra.mrb[32].mxu0 %vm60_vm0, %v1979_v19  ;;  %v1214_v23 = vpop.permute.xlu0 %1213 }
 0x57b   :  { %v1983_v24 = vpop.eup %1982 }
 0x57c   :  { %v1985_v25 = vpop.eup %1984  ;;  %1251 = vrot.lane.b32.xlu1 %v1983_v24, %s2015_s7 }
 0x57d   :  { %1249 = vrot.lane.b32.xlu0 %v1985_v25, %s2015_s7  ;;  %1765 = vmatprep.mubr.msk.f32.mxu0 %vm60_vm0, %v1985_v25 }
 0x57e   :  { %1766 = vmatmul.mubr.msk.f32.gmra.mrb[34].mxu0 %vm60_vm0, %v1983_v24  ;;  %v1216_v24 = vpop.permute.xlu1 %1215  ;;  %v1212_v25 = vpop.permute.xlu0 %1211 }
 0x57f   :  { %v1987_v26 = vpop.eup %1986 }
 0x580   :  { %v1989_v27 = vpop.eup %1988  ;;  %1255 = vrot.lane.b32.xlu1 %v1987_v26, %s2015_s7 }
 0x581   :  { %1253 = vrot.lane.b32.xlu0 %v1989_v27, %s2015_s7  ;;  %1768 = vmatprep.mubr.msk.f32.mxu0 %vm60_vm0, %v1989_v27 }
 0x582   :  { %1769 = vmatmul.mubr.msk.f32.gmra.mrb[36].mxu0 %vm60_vm0, %v1987_v26  ;;  %v1222_v26 = vpop.permute.xlu1 %1221  ;;  %v1220_v27 = vpop.permute.xlu0 %1219 }
 0x583   :  { %v1991_v28 = vpop.eup %1990 }
 0x584   :  { %v1993_v29 = vpop.eup %1992  ;;  %1259 = vrot.lane.b32.xlu1 %v1991_v28, %s2015_s7 }
 0x585   :  { %1257 = vrot.lane.b32.xlu0 %v1993_v29, %s2015_s7  ;;  %1771 = vmatprep.mubr.msk.f32.mxu0 %vm60_vm0, %v1993_v29 }
 0x586   :  { %1772 = vmatmul.mubr.msk.f32.gmra.mrb[38].mxu0 %vm60_vm0, %v1991_v28  ;;  %v1226_v28 = vpop.permute.xlu1 %1225  ;;  %v1224_v29 = vpop.permute.xlu0 %1223 }
 0x587   :  { %1794 = vmatprep.mubr.msk.f32.mxu0 %vm212_vm1, %v2127_v16 }
 0x649   :  { %v1761_v30 = vpop.f32.mrb[30].mxu0 }
 0x64a   :  { %v1031_v31 = vpop.f32.mrb[31].mxu0 }
 0x64b   :  { %v1901_v32 = vpack.c.bf16 %v1761_v30, %v1031_v31  ;;  %v1230_v30 = vpop.permute.xlu1 %1229  ;;  %v1228_v31 = vpop.permute.xlu0 %1227 }
 0x64d   :  { %v1764_v33 = vpop.f32.mrb[32].mxu0  ;;  %1902 = vmatprep.subr.bf16.mxu0 %v1901_v32  ;;  %1921 = vmatprep.subr.bf16.mxu1 %v1901_v32 }
 0x64e   :  { %v1041_v34 = vpop.f32.mrb[33].mxu0  ;;  %1904 = vmatpush3.bf16.msra.mxu0 %v1901_v32  ;;  %1926 = vmatpush3.bf16.msra.mxu1 %v1901_v32 }
 0x64f   :  { %v1905_v44 = vpack.c.bf16 %v1764_v33, %v1041_v34  ;;  %v1244_v32 = vpop.permute.xlu1 %1243  ;;  %v1242_v33 = vpop.permute.xlu0 %1241 }
 0x651   :  { %v1767_v45 = vpop.f32.mrb[34].mxu0  ;;  %1906 = vmatprep.subr.bf16.mxu0 %v1905_v44  ;;  %1922 = vmatprep.subr.bf16.mxu1 %v1905_v44 }
 0x652   :  { %v1051_v46 = vpop.f32.mrb[35].mxu0  ;;  %1908 = vmatpush3.bf16.msra.mxu0 %v1905_v44  ;;  %1927 = vmatpush3.bf16.msra.mxu1 %v1905_v44 }
 0x653   :  { %v1909_v47 = vpack.c.bf16 %v1767_v45, %v1051_v46  ;;  %v1248_v34 = vpop.permute.xlu1 %1247  ;;  %v1246_v44 = vpop.permute.xlu0 %1245 }
 0x655   :  { %v1770_v48 = vpop.f32.mrb[36].mxu0  ;;  %1910 = vmatprep.subr.bf16.mxu0 %v1909_v47  ;;  %1923 = vmatprep.subr.bf16.mxu1 %v1909_v47 }
 0x656   :  { %v1061_v16 = vpop.f32.mrb[37].mxu0  ;;  %1912 = vmatpush3.bf16.msra.mxu0 %v1909_v47  ;;  %1928 = vmatpush3.bf16.msra.mxu1 %v1909_v47 }
 0x657   :  { %v1913_v49 = vpack.c.bf16 %v1770_v48, %v1061_v16  ;;  %v1252_v45 = vpop.permute.xlu1 %1251  ;;  %v1250_v46 = vpop.permute.xlu0 %1249 }
 0x659   :  { %v1773_v50 = vpop.f32.mrb[38].mxu0  ;;  %1914 = vmatprep.subr.bf16.mxu0 %v1913_v49  ;;  %1924 = vmatprep.subr.bf16.mxu1 %v1913_v49 }
 0x65a   :  { %v1071_v51 = vpop.f32.mrb[39].mxu0  ;;  %1916 = vmatpush3.bf16.msra.mxu0 %v1913_v49  ;;  %1929 = vmatpush3.bf16.msra.mxu1 %v1913_v49 }
 0x65b   :  { %v1917_v52 = vpack.c.bf16 %v1773_v50, %v1071_v51  ;;  %v1256_v47 = vpop.permute.xlu1 %1255  ;;  %v1254_v48 = vpop.permute.xlu0 %1253  ;;  %v1312_v50 = vsel %vm60_vm0, %v2213_v1, %v1214_v23  ;;  %v1311_v51 = vsel %vm60_vm0, %v2211_v63, %v1212_v25  ;;  %v1314_v1 = vsel %vm60_vm0, %v2221_v7, %v1218_v22 }
 0x65c   :  { %v1313_v63 = vsel %vm60_vm0, %v2219_v5, %v1216_v24  ;;  %v1315_v5 = vsel %vm60_vm0, %v2227_v8, %v1220_v27  ;;  %v1317_v8 = vsel %vm60_vm0, %v2235_v10, %v1224_v29  ;;  %v1319_v10 = vsel %vm60_vm0, %v2243_v12, %v1228_v31 }
 0x65d   :  { %1918 = vmatprep.subr.bf16.mxu0 %v1917_v52  ;;  %1925 = vmatprep.subr.bf16.mxu1 %v1917_v52 }
 0x65e   :  { %1920 = vmatpush3.bf16.msra.mxu0 %v1917_v52  ;;  %1930 = vmatpush3.bf16.msra.mxu1 %v1917_v52  ;;  %v1323_v52 = vsel %vm1321_vm2, %v1312_v50, %v1244_v32 }
 0x65f   :  { %v1260_v16 = vpop.permute.xlu1 %1259  ;;  %v1258_v49 = vpop.permute.xlu0 %1257 }
 0x661   :  { %1795 = vmatmul.mubr.msk.f32.vlgmr.msra.gmra.mrb[40].mxu0 %vm212_vm1, %v2140_v35  ;;  %1798 = vmatmul.mubr.msk.f32.vlgmr.msra.gmra.mrb[30].mxu1 %vm212_vm1, %v2154_v37  ;;  %v1430_v35 = vld [vmem:[%s2461_s9] ss:$0 sm:$0xff]  ;;  %s2016_s9 = smov 96  }
 0x662   :  { %1800 = vmatprep.mubr.msk.f32.mxu1 %vm212_vm1, %v2159_v38 }
 0x665   :  { %1801 = vmatmul.mubr.msk.f32.gmra.mrb[32].mxu1 %vm212_vm1, %v2168_v39 }
 0x666   :  { %1803 = vmatprep.mubr.msk.f32.mxu1 %vm212_vm1, %v2173_v40 }
 0x669   :  { %1804 = vmatmul.mubr.msk.f32.gmra.mrb[34].mxu1 %vm212_vm1, %v2182_v41 }
 0x66a   :  { %1806 = vmatprep.mubr.msk.f32.mxu1 %vm212_vm1, %v2187_v42 }
 0x66d   :  { %1807 = vmatmul.mubr.msk.f32.gmra.mrb[36].mxu1 %vm212_vm1, %v2196_v43 }
 0x734   :  { %v1796_v37 = vpop.f32.mrb[40].mxu0  ;;  %v1799_v38 = vpop.f32.mrb[30].mxu1 }
 0x735   :  { %v1158_v53 = vadd.f32 %v1796_v37, %v1430_v35  ;;  %v1152_v39 = vpop.f32.mrb[41].mxu0  ;;  %v1168_v54 = vadd.f32 %v1799_v38, %v1430_v35  ;;  %v1162_v55 = vpop.f32.mrb[31].mxu1  ;;  %v1322_v37 = vsel %vm1321_vm2, %v1311_v51, %v1242_v33 }
 0x736   :  { %v1153_v40 = vadd.f32 %v1430_v35, %v1152_v39  ;;  %v1163_v56 = vadd.f32 %v1430_v35, %v1162_v55 }
 0x737   :  { %1994 = vtanh.f32 %v1158_v53 }
 0x738   :  { %1996 = vtanh.f32 %v1153_v40  ;;  %v1802_v41 = vpop.f32.mrb[32].mxu1  ;;  %v1324_v40 = vsel %vm1321_vm2, %v1313_v63, %v1246_v44 }
 0x739   :  { %1998 = vtanh.f32 %v1168_v54  ;;  %v1178_v42 = vadd.f32 %v1802_v41, %v1430_v35  ;;  %v1172_v57 = vpop.f32.mrb[33].mxu1  ;;  %v1325_v54 = vsel %vm1321_vm2, %v1314_v1, %v1248_v34 }
 0x73a   :  { %2000 = vtanh.f32 %v1163_v56  ;;  %v1173_v43 = vadd.f32 %v1430_v35, %v1172_v57 }
 0x73b   :  { %2002 = vtanh.f32 %v1178_v42  ;;  %v1316_v42 = vsel %vm60_vm0, %v2229_v9, %v1222_v26 }
 0x73c   :  { %v1805_v36 = vpop.f32.mrb[34].mxu1  ;;  %2004 = vtanh.f32 %v1173_v43  ;;  %v1327_v57 = vsel %vm1321_vm2, %v1316_v42, %v1252_v45 }
 0x73d   :  { %v1188_v58 = vadd.f32 %v1805_v36, %v1430_v35  ;;  %v1182_v59 = vpop.f32.mrb[35].mxu1  ;;  %v1326_v36 = vsel %vm1321_vm2, %v1315_v5, %v1250_v46 }
 0x73e   :  { %v1183_v60 = vadd.f32 %v1430_v35, %v1182_v59 }
 0x73f   :  { %2006 = vtanh.f32 %v1188_v58 }
 0x740   :  { %v1808_v61 = vpop.f32.mrb[36].mxu1  ;;  %2008 = vtanh.f32 %v1183_v60  ;;  %v1318_v60 = vsel %vm60_vm0, %v2237_v11, %v1226_v28 }
 0x741   :  { %v1995_v62 = vpop.eup %1994  ;;  %v1198_v0 = vadd.f32 %v1808_v61, %v1430_v35  ;;  %v1192_v2 = vpop.f32.mrb[37].mxu1  ;;  %v1329_v61 = vsel %vm1321_vm2, %v1318_v60, %v1256_v47 }
 0x742   :  { %v1997_v3 = vpop.eup %1996  ;;  %1283 = vrot.lane.b32.xlu1 %v1995_v62, %s2016_s9  ;;  %v1193_v4 = vadd.f32 %v1430_v35, %v1192_v2 }
 0x743   :  { %v1999_v6 = vpop.eup %1998  ;;  %1281 = vrot.lane.b32.xlu0 %v1997_v3, %s2016_s9  ;;  %2010 = vtanh.f32 %v1198_v0  ;;  %v1328_v0 = vsel %vm1321_vm2, %v1317_v8, %v1254_v48 }
 0x744   :  { %v2001_v14 = vpop.eup %2000  ;;  %2012 = vtanh.f32 %v1193_v4  ;;  %v1320_v4 = vsel %vm60_vm0, %v2245_v13, %v1230_v30 }
 0x745   :  { %v2003_v15 = vpop.eup %2002 }
 0x746   :  { %1287 = vrot.lane.b32.xlu1 %v1999_v6, %s2016_s9  ;;  %v2005_v17 = vpop.eup %2004  ;;  %v1331_v6 = vsel %vm1321_vm2, %v1320_v4, %v1260_v16 }
 0x747   :  { %1285 = vrot.lane.b32.xlu0 %v2001_v14, %s2016_s9 }
 0x749   :  { %v2007_v18 = vpop.eup %2006 }
 0x74a   :  { %1291 = vrot.lane.b32.xlu1 %v2003_v15, %s2016_s9  ;;  %v2009_v19 = vpop.eup %2008  ;;  %v1330_v15 = vsel %vm1321_vm2, %v1319_v10, %v1258_v49 }
 0x74b   :  { %1289 = vrot.lane.b32.xlu0 %v2005_v17, %s2016_s9 }
 0x74d   :  { %v2011_v20 = vpop.eup %2010 }
 0x74e   :  { %1295 = vrot.lane.b32.xlu1 %v2007_v18, %s2016_s9  ;;  %v2013_v21 = vpop.eup %2012 }
 0x74f   :  { %1293 = vrot.lane.b32.xlu0 %v2009_v19, %s2016_s9 }
 0x752   :  { %1299 = vrot.lane.b32.xlu1 %v2011_v20, %s2016_s9 }
 0x753   :  { %1297 = vrot.lane.b32.xlu0 %v2013_v21, %s2016_s9 }
 0x7b4   :  { %v1284_v35 = vpop.permute.xlu1 %1283 }
 0x7b5   :  { %v1334_v38 = vsel %vm1332_vm3, %v1323_v52, %v1284_v35  ;;  %v1282_v53 = vpop.permute.xlu0 %1281 }
 0x7b6   :  { %1344 = vst [vmem:[%s2462_s10 + $0x8] sm:$0xff] %v1334_v38  ;;  %v1333_v39 = vsel %vm1332_vm3, %v1322_v37, %v1282_v53 }
 0x7b7   :  { %1343 = vst [vmem:[%s2462_s10] sm:$0xff] %v1333_v39 }
 0x7b8   :  { %v1288_v55 = vpop.permute.xlu1 %1287 }
 0x7b9   :  { %v1336_v56 = vsel %vm1332_vm3, %v1325_v54, %v1288_v55  ;;  %v1286_v41 = vpop.permute.xlu0 %1285 }
 0x7ba   :  { %1346 = vst [vmem:[%s2462_s10 + $0x18] sm:$0xff] %v1336_v56  ;;  %v1335_v7 = vsel %vm1332_vm3, %v1324_v40, %v1286_v41 }
 0x7bb   :  { %1345 = vst [vmem:[%s2462_s10 + $0x10] sm:$0xff] %v1335_v7 }
 0x7bc   :  { %v1292_v43 = vpop.permute.xlu1 %1291 }
 0x7bd   :  { %v1338_v58 = vsel %vm1332_vm3, %v1327_v57, %v1292_v43  ;;  %v1290_v59 = vpop.permute.xlu0 %1289 }
 0x7be   :  { %1348 = vst [vmem:[%s2462_s10 + $0x28] sm:$0xff] %v1338_v58  ;;  %v1337_v9 = vsel %vm1332_vm3, %v1326_v36, %v1290_v59 }
 0x7bf   :  { %1347 = vst [vmem:[%s2462_s10 + $0x20] sm:$0xff] %v1337_v9 }
 0x7c0   :  { %v1296_v62 = vpop.permute.xlu1 %1295 }
 0x7c1   :  { %v1340_v2 = vsel %vm1332_vm3, %v1329_v61, %v1296_v62  ;;  %v1294_v3 = vpop.permute.xlu0 %1293 }
 0x7c2   :  { %1350 = vst [vmem:[%s2462_s10 + $0x38] sm:$0xff] %v1340_v2  ;;  %v1339_v11 = vsel %vm1332_vm3, %v1328_v0, %v1294_v3 }
 0x7c3   :  { %1349 = vst [vmem:[%s2462_s10 + $0x30] sm:$0xff] %v1339_v11 }
 0x7c4   :  { %v1300_v14 = vpop.permute.xlu1 %1299 }
 0x7c5   :  { %v1342_v17 = vsel %vm1332_vm3, %v1331_v6, %v1300_v14  ;;  %v1298_v18 = vpop.permute.xlu0 %1297 }
 0x7c6   :  { %1352 = vst [vmem:[%s2462_s10 + $0x48] sm:$0xff] %v1342_v17  ;;  %v1341_v13 = vsel %vm1332_vm3, %v1330_v15, %v1298_v18 }
 0x7c7   :  { %1351 = vst [vmem:[%s2462_s10 + $0x40] sm:$0xff] %v1341_v13 }

// kernel: dgcnn_forward.3
= control target key start
LH: loop header
LB: loop body
LE: loop exit
PB: predicated region body
PF: predicated region fallthrough
CT: control target
= control target key end

     0   :  { %v1115_v32 = vmov 0.0|0.0   ;;  %vm183_vm0 = vcmask 1041408   ;;  %vm1116_vm1 = vmmov 0   ;;  %vm204_vm2 = vcmask 1045504   ;;  %s1119_s12 = smov 16   ;;  %s1120_s13 = smov 48   ;;  %s1545_s1 = inlined_call_operand.vmem [shape: f32[128,16], index: 1, kind: input, shape index: {}]   ;;  %s1546_s0 = inlined_call_operand.vmem [shape: f32[60,128], index: 0, kind: input, shape index: {}]   ;;  %s1547_s3 = inlined_call_operand.vmem [shape: f32[80,32], index: 3, kind: input, shape index: {}]   ;;  %s1548_s2 = inlined_call_operand.vmem [shape: f32[1,16], index: 2, kind: input, shape index: {}]   ;;  %s1549_s5 = inlined_call_operand.vmem [shape: f32[352,128], index: 5, kind: input, shape index: {}]   ;;  %s1550_s4 = inlined_call_operand.vmem [shape: f32[1,32], index: 4, kind: input, shape index: {}]   ;;  %s1551_s7 = inlined_call_operand.vmem [shape: f32[128,1], index: 7, kind: input, shape index: {}]   ;;  %s1552_s8 = inlined_call_operand.<no memory space> [shape: f32[1,1], index: 8, kind: input, shape index: {}]   ;;  %s1553_s6 = inlined_call_operand.vmem [shape: f32[1,128], index: 6, kind: input, shape index: {}]   ;;  %s1554_s9 = inlined_call_operand.vmem [shape: f32[2,1], index: 9, kind: output, shape index: {}]  }
   0x1   :  { %v42_v0 = vld [vmem:[%s1545_s1] sm:$0xff]  ;;  %v43_v1 = vld [vmem:[%s1545_s1 + $0x8] sm:$0xff]  ;;  %v44_v2 = vld [vmem:[%s1545_s1 + $0x10] sm:$0xff]  ;;  %vm220_vm3 = vcmask 1043456   ;;  %s1121_s14 = smov 32   ;;  %vm262_vm4 = vcmask 130048  }
   0x2   :  { %v971_v3 = vpack.c.bf16 %v43_v1, %v42_v0  ;;  %v45_v4 = vld [vmem:[%s1545_s1 + $0x18] sm:$0xff]  ;;  %v46_v6 = vld [vmem:[%s1545_s1 + $0x20] sm:$0xff]  ;;  %v47_v7 = vld [vmem:[%s1545_s1 + $0x28] sm:$0xff]  ;;  %vm266_vm5 = vcmask 261120   ;;  %vm270_vm6 = vcmask 392192   ;;  %vm274_vm7 = vcmask 523264  }
   0x3   :  { %v975_v5 = vpack.c.bf16 %v45_v4, %v44_v2  ;;  %v979_v8 = vpack.c.bf16 %v47_v7, %v46_v6  ;;  %v34_v9 = vld [vmem:[%s1546_s0] sm:$0xff]  ;;  %v48_v10 = vld [vmem:[%s1545_s1 + $0x30] sm:$0xff]  ;;  %v49_v11 = vld [vmem:[%s1545_s1 + $0x38] sm:$0xff]  ;;  %vm295_vm8 = vcmask 654336   ;;  %vm425_vm9 = vcmask 785408  }
   0x4   :  { %972 = vmatprep.subr.bf16.mxu0 %v971_v3  ;;  %868 = vmatprep.mubr.f32.mxu0 %v34_v9  ;;  %v983_v12 = vpack.c.bf16 %v49_v11, %v48_v10  ;;  %v50_v13 = vld [vmem:[%s1545_s1 + $0x40] sm:$0xff]  ;;  %v51_v14 = vld [vmem:[%s1545_s1 + $0x48] sm:$0xff]  ;;  %v52_v16 = vld [vmem:[%s1545_s1 + $0x50] sm:$0xff]  ;;  %vm720_vm10 = vcmask 1024  }
   0x5   :  { %974 = vmatpush3.bf16.msra.mxu0 %v971_v3  ;;  %v987_v15 = vpack.c.bf16 %v51_v14, %v50_v13  ;;  %v53_v17 = vld [vmem:[%s1545_s1 + $0x58] sm:$0xff]  ;;  %v54_v19 = vld [vmem:[%s1545_s1 + $0x60] sm:$0xff]  ;;  %v55_v20 = vld [vmem:[%s1545_s1 + $0x68] sm:$0xff]  ;;  %v1117_v13 = vmov 0.0  }
   0x6   :  { %976 = vmatprep.subr.bf16.mxu0 %v975_v5  ;;  %v991_v18 = vpack.c.bf16 %v53_v17, %v52_v16  ;;  %v995_v21 = vpack.c.bf16 %v55_v20, %v54_v19  ;;  %v56_v22 = vld [vmem:[%s1545_s1 + $0x70] sm:$0xff]  ;;  %v57_v23 = vld [vmem:[%s1545_s1 + $0x78] sm:$0xff]  ;;  %v35_v25 = vld [vmem:[%s1546_s0 + $0x8] sm:$0xff] }
   0x7   :  { %v999_v24 = vpack.c.bf16 %v57_v23, %v56_v22  ;;  %v36_v26 = vld [vmem:[%s1546_s0 + $0x10] sm:$0xff]  ;;  %v37_v27 = vld [vmem:[%s1546_s0 + $0x18] sm:$0xff]  ;;  %v38_v28 = vld [vmem:[%s1546_s0 + $0x20] sm:$0xff] }
   0x8   :  { %v39_v29 = vld [vmem:[%s1546_s0 + $0x28] sm:$0xff]  ;;  %v40_v30 = vld [vmem:[%s1546_s0 + $0x30] sm:$0xff]  ;;  %v41_v31 = vld [vmem:[%s1546_s0 + $0x38] sm:$0xf] }
   0x9   :  { %978 = vmatpush3.bf16.msra.mxu0 %v975_v5  ;;  %v278_v33 = vld [vmem:[%s1547_s3] sm:$0xff]  ;;  %v279_v34 = vld [vmem:[%s1547_s3 + $0x8] sm:$0xff]  ;;  %v280_v35 = vld [vmem:[%s1547_s3 + $0x10] sm:$0xff] }
   0xa   :  { %980 = vmatprep.subr.bf16.mxu0 %v979_v8  ;;  %v1004_v36 = vpack.c.bf16 %v279_v34, %v278_v33  ;;  %v281_v37 = vld [vmem:[%s1547_s3 + $0x18] sm:$0xff]  ;;  %v282_v39 = vld [vmem:[%s1547_s3 + $0x20] sm:$0xff]  ;;  %v283_v40 = vld [vmem:[%s1547_s3 + $0x28] sm:$0xff] }
   0xb   :  { %v1007_v38 = vpack.c.bf16 %v281_v37, %v280_v35  ;;  %v1010_v41 = vpack.c.bf16 %v283_v40, %v282_v39  ;;  %v726_v45 = vld [vmem:[%s1548_s2] ss:$0 sm:$0xff]  ;;  %v284_v48 = vld [vmem:[%s1547_s3 + $0x30] sm:$0xff]  ;;  %v285_v49 = vld [vmem:[%s1547_s3 + $0x38] sm:$0xff] }
   0xc   :  { %v1013_v51 = vpack.c.bf16 %v285_v49, %v284_v48  ;;  %v286_v59 = vld [vmem:[%s1547_s3 + $0x40] sm:$0xff]  ;;  %v287_v60 = vld [vmem:[%s1547_s3 + $0x48] sm:$0xff]  ;;  %s1118_s3 = smov 64  }
   0xd   :  { %982 = vmatpush3.bf16.msra.mxu0 %v979_v8  ;;  %v1016_v63 = vpack.c.bf16 %v287_v60, %v286_v59 }
   0xe   :  { %984 = vmatprep.subr.bf16.mxu0 %v983_v12 }
  0x11   :  { %986 = vmatpush3.bf16.msra.mxu0 %v983_v12 }
  0x12   :  { %988 = vmatprep.subr.bf16.mxu0 %v987_v15 }
  0x15   :  { %990 = vmatpush3.bf16.msra.mxu0 %v987_v15 }
  0x16   :  { %992 = vmatprep.subr.bf16.mxu0 %v991_v18 }
  0x19   :  { %994 = vmatpush3.bf16.msra.mxu0 %v991_v18 }
  0x1a   :  { %996 = vmatprep.subr.bf16.mxu0 %v995_v21 }
  0x1d   :  { %998 = vmatpush3.bf16.msra.mxu0 %v995_v21 }
  0x1e   :  { %1000 = vmatprep.subr.bf16.mxu0 %v999_v24 }
  0x21   :  { %1002 = vmatpush3.bf16.msra.mxu0 %v999_v24 }
  0x22   :  { %1003 = vmatprep.subr.bf16.mxu0 %v1115_v32 }
  0x24   :  { %869 = vmatmul.mubr.f32.vlgmr.msra.gmra.mrb[0].mxu0 %v35_v25 }
  0x25   :  { %871 = vmatprep.mubr.f32.mxu0 %v36_v26  ;;  %1005 = vmatpush3.bf16.msra.mxu0 %v1004_v36 }
  0x26   :  { %1006 = vmatprep.subr.bf16.mxu0 %v1115_v32 }
  0x28   :  { %872 = vmatmul.mubr.f32.gmra.mrb[2].mxu0 %v37_v27 }
  0x29   :  { %874 = vmatprep.mubr.f32.mxu0 %v38_v28  ;;  %1008 = vmatpush3.bf16.msra.mxu0 %v1007_v38 }
  0x2a   :  { %1009 = vmatprep.subr.bf16.mxu0 %v1115_v32 }
  0x2c   :  { %875 = vmatmul.mubr.f32.gmra.mrb[4].mxu0 %v39_v29 }
  0x2d   :  { %877 = vmatprep.mubr.f32.mxu0 %v40_v30  ;;  %1011 = vmatpush3.bf16.msra.mxu0 %v1010_v41 }
  0x2e   :  { %1012 = vmatprep.subr.bf16.mxu0 %v1115_v32 }
  0x30   :  { %878 = vmatmul.mubr.f32.gmra.mrb[6].mxu0 %v41_v31 }
  0x31   :  { %1014 = vmatpush3.bf16.msra.mxu0 %v1013_v51  ;;  %900 = vmatprep.mubr.msk.f32.mxu0 %vm1116_vm1, %v1117_v13 }
  0x32   :  { %1015 = vmatprep.subr.bf16.mxu0 %v1115_v32 }
  0x35   :  { %1017 = vmatpush3.bf16.msra.mxu0 %v1016_v63 }
  0x36   :  { %1050 = vmatprep.subr.bf16.mxu0 %v1115_v32 }
  0xf7   :  { %v870_v42 = vpop.f32.mrb[0].mxu0 }
  0xf8   :  { %v131_v43 = vpop.f32.mrb[1].mxu0  ;;  %v137_v52 = vadd.f32 %v870_v42, %v726_v45 }
  0xf9   :  { %v132_v57 = vadd.f32 %v726_v45, %v131_v43 }
  0xfa   :  { %v171_v0 = vmax.f32 %v137_v52, 0.0 }
  0xfb   :  { %v873_v44 = vpop.f32.mrb[2].mxu0  ;;  %v170_v8 = vmax.f32 %v132_v57, 0.0 }
  0xfc   :  { %v141_v46 = vpop.f32.mrb[3].mxu0  ;;  %v147_v47 = vadd.f32 %v873_v44, %v726_v45 }
  0xfd   :  { %v142_v5 = vadd.f32 %v726_v45, %v141_v46 }
  0xfe   :  { %v173_v55 = vmax.f32 %v147_v47, 0.0 }
  0xff   :  { %v876_v50 = vpop.f32.mrb[4].mxu0  ;;  %v172_v17 = vmax.f32 %v142_v5, 0.0  ;;  %v432_v5 = vld [vmem:[%s1549_s5] sm:$0xff] }
 0x100   :  { %v157_v53 = vadd.f32 %v876_v50, %v726_v45  ;;  %v151_v54 = vpop.f32.mrb[5].mxu0  ;;  %v184_v4 = vrot.slane %v173_v55, 6 }
 0x101   :  { %v152_v56 = vadd.f32 %v726_v45, %v151_v54 }
 0x102   :  { %v175_v58 = vmax.f32 %v157_v53, 0.0 }
 0x103   :  { %v174_v61 = vmax.f32 %v152_v56, 0.0  ;;  %v879_v62 = vpop.f32.mrb[6].mxu0 }
 0x104   :  { %v187_v1 = vrot.slane %v175_v58, 6  ;;  %v167_v2 = vadd.f32 %v879_v62, %v726_v45  ;;  %v161_v3 = vpop.f32.mrb[7].mxu0 }
 0x105   :  { %v185_v6 = vrot.slane %v174_v61, 6  ;;  %v162_v7 = vadd.f32 %v726_v45, %v161_v3  ;;  %v448_v3 = vld [vmem:[%s1549_s5 + $0x80] sm:$0xff] }
 0x106   :  { %v177_v9 = vmax.f32 %v167_v2, 0.0 }
 0x107   :  { %v186_v10 = vsel %vm183_vm0, %v184_v4, %v185_v6  ;;  %v188_v11 = vsel %vm183_vm0, %v185_v6, %v187_v1  ;;  %v176_v12 = vmax.f32 %v162_v7, 0.0  ;;  %v449_v4 = vld [vmem:[%s1549_s5 + $0x88] sm:$0xff] }
 0x108   :  { %v197_v14 = vmax.f32 %v170_v8, %v186_v10  ;;  %v198_v15 = vmax.f32 %v171_v0, %v188_v11  ;;  %v191_v16 = vrot.slane %v177_v9, 6  ;;  %v1018_v6 = vpack.c.bf16 %v449_v4, %v448_v3  ;;  %v433_v7 = vld [vmem:[%s1549_s5 + $0x8] sm:$0xff]  ;;  %v450_v8 = vld [vmem:[%s1549_s5 + $0x90] sm:$0xff]  ;;  %v451_v9 = vld [vmem:[%s1549_s5 + $0x98] sm:$0xff] }
 0x109   :  { %v189_v18 = vrot.slane %v176_v12, 6  ;;  %v1020_v10 = vpack.c.bf16 %v433_v7, %v432_v5  ;;  %v1022_v11 = vpack.c.bf16 %v451_v9, %v450_v8  ;;  %v434_v12 = vld [vmem:[%s1549_s5 + $0x10] sm:$0xff]  ;;  %v463_v3 = vld [vmem:[%s1549_s5 + $0xf8] sm:$0xff] }
 0x10a   :  { %253 = vrot.lane.b32.xlu1 %v198_v15, %s1118_s3  ;;  %v205_v19 = vrot.slane %v197_v14, 2  ;;  %v206_v20 = vrot.slane %v198_v15, 2  ;;  %v237_v21 = vrot.slane %v197_v14, 6  ;;  %v238_v22 = vrot.slane %v198_v15, 6  ;;  %1019 = vmatprep.subr.bf16.mxu1 %v1018_v6  ;;  %v446_v5 = vld [vmem:[%s1549_s5 + $0x70] sm:$0xff]  ;;  %v447_v6 = vld [vmem:[%s1549_s5 + $0x78] sm:$0xff] }
 0x10b   :  { %v190_v23 = vsel %vm183_vm0, %v187_v1, %v189_v18  ;;  %v192_v24 = vsel %vm183_vm0, %v189_v18, %v191_v16  ;;  %v221_v25 = vrot.slane %v197_v14, 4  ;;  %v222_v26 = vrot.slane %v198_v15, 4  ;;  %v453_v16 = vld [vmem:[%s1549_s5 + $0xa8] sm:$0xff]  ;;  %1021 = vmatpush3.bf16.msra.mxu1 %v1020_v10  ;;  %v464_v18 = vld [vmem:[%s1549_s5 + $0x100] sm:$0xff]  ;;  %v474_v9 = vld [vmem:[%s1549_s5 + $0x150] sm:$0xff] }
 0x10c   :  { %v199_v27 = vmax.f32 %v172_v17, %v190_v23  ;;  %v200_v28 = vmax.f32 %v173_v55, %v192_v24  ;;  %v207_v29 = vsel %vm204_vm2, %v205_v19, %v206_v20  ;;  %v239_v30 = vsel %vm183_vm0, %v237_v21, %v238_v22  ;;  %v465_v19 = vld [vmem:[%s1549_s5 + $0x108] sm:$0xff]  ;;  %1023 = vmatprep.subr.bf16.mxu1 %v1022_v11  ;;  %v436_v21 = vld [vmem:[%s1549_s5 + $0x20] sm:$0xff]  ;;  %v454_v24 = vld [vmem:[%s1549_s5 + $0xb0] sm:$0xff] }
 0x10d   :  { %210 = vrot.lane.b32.xlu0 %v207_v29, %s1119_s12  ;;  %v223_v33 = vsel %vm220_vm3, %v221_v25, %v222_v26  ;;  %v1051_v23 = vpack.c.bf16 %v465_v19, %v464_v18  ;;  %v455_v25 = vld [vmem:[%s1549_s5 + $0xb8] sm:$0xff]  ;;  %v1048_v8 = vpack.c.bf16 %v447_v6, %v446_v5  ;;  %v639_v5 = vld [vmem:[%s1551_s7 + $0x60] sm:$0xff]  ;;  %v640_v6 = vld [vmem:[%s1551_s7 + $0x68] sm:$0xff] }
 0x10e   :  { %244 = vrot.lane.b32.xlu1 %v239_v30, %s1120_s13  ;;  %v224_v31 = vrot.slane %v199_v27, 4  ;;  %v208_v35 = vrot.slane %v199_v27, 2  ;;  %v240_v37 = vrot.slane %v199_v27, 6  ;;  %v226_v38 = vrot.slane %v200_v28, 4  ;;  %v468_v30 = vld [vmem:[%s1549_s5 + $0x120] sm:$0xff]  ;;  %v475_v10 = vld [vmem:[%s1549_s5 + $0x158] sm:$0xff] }
 0x10f   :  { %v242_v41 = vrot.slane %v200_v28, 6 }
 0x110   :  { %v225_v34 = vsel %vm220_vm3, %v222_v26, %v224_v31  ;;  %v209_v36 = vsel %vm204_vm2, %v206_v20, %v208_v35  ;;  %v241_v39 = vsel %vm183_vm0, %v238_v22, %v240_v37  ;;  %v227_v40 = vsel %vm220_vm3, %v224_v31, %v226_v38  ;;  %v437_v22 = vld [vmem:[%s1549_s5 + $0x28] sm:$0xff]  ;;  %v466_v26 = vld [vmem:[%s1549_s5 + $0x110] sm:$0xff] }
 0x111   :  { %228 = vrot.lane.b32.xlu0 %v223_v33, %s1121_s14  ;;  %v243_v42 = vsel %vm183_vm0, %v240_v37, %v242_v41  ;;  %v1028_v29 = vpack.c.bf16 %v437_v22, %v436_v21  ;;  %v469_v31 = vld [vmem:[%s1549_s5 + $0x128] sm:$0xff]  ;;  %v1030_v33 = vpack.c.bf16 %v455_v25, %v454_v24  ;;  %v471_v41 = vld [vmem:[%s1549_s5 + $0x138] sm:$0xff] }
 0x112   :  { %230 = vrot.lane.b32.xlu1 %v225_v34, %s1121_s14  ;;  %v438_v34 = vld [vmem:[%s1549_s5 + $0x30] sm:$0xff]  ;;  %v457_v37 = vld [vmem:[%s1549_s5 + $0xc8] sm:$0xff]  ;;  %v1057_v38 = vpack.c.bf16 %v469_v31, %v468_v30 }
 0x115   :  { %212 = vrot.lane.b32.xlu0 %v209_v36, %s1119_s12  ;;  %v456_v36 = vld [vmem:[%s1549_s5 + $0xc0] sm:$0xff] }
 0x116   :  { %255 = vrot.lane.b32.xlu1 %v199_v27, %s1118_s3 }
 0x119   :  { %246 = vrot.lane.b32.xlu0 %v241_v39, %s1120_s13 }
 0x11a   :  { %232 = vrot.lane.b32.xlu1 %v227_v40, %s1121_s14  ;;  %v470_v40 = vld [vmem:[%s1549_s5 + $0x130] sm:$0xff] }
 0x11d   :  { %214 = vrot.lane.b32.xlu0 %v208_v35, %s1119_s12  ;;  %v439_v35 = vld [vmem:[%s1549_s5 + $0x38] sm:$0xff] }
 0x11e   :  { %257 = vrot.lane.b32.xlu1 %v200_v28, %s1118_s3  ;;  %v1032_v39 = vpack.c.bf16 %v439_v35, %v438_v34 }
 0x121   :  { %248 = vrot.lane.b32.xlu0 %v243_v42, %s1120_s13  ;;  %v1034_v42 = vpack.c.bf16 %v457_v37, %v456_v36 }
 0x17c   :  { %v254_v43 = vpop.permute.xlu1 %253 }
 0x17f   :  { %v211_v44 = vpop.permute.xlu0 %210 }
 0x180   :  { %v245_v45 = vpop.permute.xlu1 %244  ;;  %v263_v46 = vsel %vm262_vm4, %v197_v14, %v211_v44  ;;  %v435_v14 = vld [vmem:[%s1549_s5 + $0x18] sm:$0xff]  ;;  %v441_v44 = vld [vmem:[%s1549_s5 + $0x48] sm:$0xff] }
 0x181   :  { %v1024_v17 = vpack.c.bf16 %v435_v14, %v434_v12 }
 0x183   :  { %v229_v47 = vpop.permute.xlu0 %228  ;;  %1025 = vmatpush3.bf16.msra.mxu1 %v1024_v17 }
 0x184   :  { %v267_v48 = vsel %vm266_vm5, %v263_v46, %v229_v47  ;;  %v231_v49 = vpop.permute.xlu1 %230  ;;  %v459_v46 = vld [vmem:[%s1549_s5 + $0xd8] sm:$0xff]  ;;  %v1060_v47 = vpack.c.bf16 %v471_v41, %v470_v40  ;;  %v627_v41 = vld [vmem:[%s1551_s7] sm:$0xff] }
 0x185   :  { %v271_v50 = vsel %vm270_vm6, %v267_v48, %v245_v45  ;;  %v458_v45 = vld [vmem:[%s1549_s5 + $0xd0] sm:$0xff] }
 0x186   :  { %v275_v51 = vsel %vm274_vm7, %v271_v50, %v254_v43  ;;  %v440_v43 = vld [vmem:[%s1549_s5 + $0x40] sm:$0xff]  ;;  %v442_v50 = vld [vmem:[%s1549_s5 + $0x50] sm:$0xff] }
 0x187   :  { %901 = vmatmul.mubr.msk.f32.vlgmr.msra.gmra.mrb[8].mxu0 %vm295_vm8, %v275_v51  ;;  %v213_v52 = vpop.permute.xlu0 %212  ;;  %v1036_v48 = vpack.c.bf16 %v441_v44, %v440_v43  ;;  %v443_v51 = vld [vmem:[%s1549_s5 + $0x58] sm:$0xff] }
 0x188   :  { %v264_v53 = vsel %vm262_vm4, %v198_v15, %v213_v52  ;;  %v256_v54 = vpop.permute.xlu1 %255  ;;  %903 = vmatprep.mubr.msk.f32.mxu0 %vm1116_vm1, %v1117_v13  ;;  %v452_v15 = vld [vmem:[%s1549_s5 + $0xa0] sm:$0xff]  ;;  %1052 = vmatpush3.bf16.msra.mxu0 %v1051_v23  ;;  %v1040_v52 = vpack.c.bf16 %v443_v51, %v442_v50 }
 0x189   :  { %v268_v55 = vsel %vm266_vm5, %v264_v53, %v231_v49  ;;  %v1026_v20 = vpack.c.bf16 %v453_v16, %v452_v15  ;;  %1053 = vmatprep.subr.bf16.mxu0 %v1115_v32  ;;  %v1038_v49 = vpack.c.bf16 %v459_v46, %v458_v45  ;;  %v1066_v15 = vpack.c.bf16 %v475_v10, %v474_v9  ;;  %v642_v9 = vld [vmem:[%s1551_s7 + $0x78] sm:$0xff] }
 0x18b   :  { %v247_v56 = vpop.permute.xlu0 %246  ;;  %1027 = vmatprep.subr.bf16.mxu1 %v1026_v20 }
 0x18c   :  { %v272_v57 = vsel %vm270_vm6, %v268_v55, %v247_v56  ;;  %v233_v59 = vpop.permute.xlu1 %232  ;;  %1029 = vmatpush3.bf16.msra.mxu1 %v1028_v29  ;;  %v460_v56 = vld [vmem:[%s1549_s5 + $0xe0] sm:$0xff] }
 0x18d   :  { %v276_v58 = vsel %vm274_vm7, %v272_v57, %v256_v54  ;;  %1031 = vmatprep.subr.bf16.mxu1 %v1030_v33  ;;  %v727_v54 = vld [vmem:[%s1550_s4] ss:$0 sm:$0xff]  ;;  %v461_v57 = vld [vmem:[%s1549_s5 + $0xe8] sm:$0xff] }
 0x18e   :  { %904 = vmatmul.mubr.msk.f32.gmra.mrb[10].mxu0 %vm295_vm8, %v276_v58  ;;  %v1042_v58 = vpack.c.bf16 %v461_v57, %v460_v56 }
 0x18f   :  { %v215_v60 = vpop.permute.xlu0 %214  ;;  %906 = vmatprep.mubr.msk.f32.mxu0 %vm1116_vm1, %v1117_v13 }
 0x190   :  { %v265_v61 = vsel %vm262_vm4, %v199_v27, %v215_v60  ;;  %v258_v0 = vpop.permute.xlu1 %257  ;;  %v467_v27 = vld [vmem:[%s1549_s5 + $0x118] sm:$0xff]  ;;  %1033 = vmatpush3.bf16.msra.mxu1 %v1032_v39  ;;  %v445_v60 = vld [vmem:[%s1549_s5 + $0x68] sm:$0xff] }
 0x191   :  { %v269_v62 = vsel %vm266_vm5, %v265_v61, %v233_v59  ;;  %v1054_v28 = vpack.c.bf16 %v467_v27, %v466_v26  ;;  %1035 = vmatprep.subr.bf16.mxu1 %v1034_v42  ;;  %v444_v59 = vld [vmem:[%s1549_s5 + $0x60] sm:$0xff]  ;;  %v628_v42 = vld [vmem:[%s1551_s7 + $0x8] sm:$0xff] }
 0x192   :  { %v1044_v61 = vpack.c.bf16 %v445_v60, %v444_v59  ;;  %v632_v59 = vld [vmem:[%s1551_s7 + $0x28] sm:$0xff] }
 0x193   :  { %v249_v63 = vpop.permute.xlu0 %248  ;;  %1055 = vmatpush3.bf16.msra.mxu0 %v1054_v28 }
 0x194   :  { %v273_v1 = vsel %vm270_vm6, %v269_v62, %v249_v63  ;;  %1056 = vmatprep.subr.bf16.mxu0 %v1115_v32  ;;  %1037 = vmatpush3.bf16.msra.mxu1 %v1036_v48  ;;  %v472_v62 = vld [vmem:[%s1549_s5 + $0x140] sm:$0xff]  ;;  %v473_v63 = vld [vmem:[%s1549_s5 + $0x148] sm:$0xff] }
 0x195   :  { %v277_v2 = vsel %vm274_vm7, %v273_v1, %v258_v0  ;;  %1039 = vmatprep.subr.bf16.mxu1 %v1038_v49  ;;  %v1063_v1 = vpack.c.bf16 %v473_v63, %v472_v62  ;;  %v1069_v49 = vpack.c.bf16 %v628_v42, %v627_v41  ;;  %v634_v62 = vld [vmem:[%s1551_s7 + $0x38] sm:$0xff] }
 0x196   :  { %907 = vmatmul.mubr.msk.f32.gmra.mrb[12].mxu0 %vm295_vm8, %v277_v2  ;;  %v462_v2 = vld [vmem:[%s1549_s5 + $0xf0] sm:$0xff]  ;;  %s1122_s5 = smov 96  }
 0x197   :  { %933 = vmatprep.mubr.msk.f32.mxu0 %vm1116_vm1, %v1117_v13  ;;  %1058 = vmatpush3.bf16.msra.mxu0 %v1057_v38  ;;  %v1046_v4 = vpack.c.bf16 %v463_v3, %v462_v2  ;;  %v637_v2 = vld [vmem:[%s1551_s7 + $0x50] sm:$0xff]  ;;  %v638_v3 = vld [vmem:[%s1551_s7 + $0x58] sm:$0xff] }
 0x198   :  { %1059 = vmatprep.subr.bf16.mxu0 %v1115_v32  ;;  %1041 = vmatpush3.bf16.msra.mxu1 %v1040_v52 }
 0x199   :  { %1043 = vmatprep.subr.bf16.mxu1 %v1042_v58  ;;  %v631_v58 = vld [vmem:[%s1551_s7 + $0x20] sm:$0xff] }
 0x19a   :  { %v1075_v60 = vpack.c.bf16 %v632_v59, %v631_v58 }
 0x19b   :  { %1061 = vmatpush3.bf16.msra.mxu0 %v1060_v47 }
 0x19c   :  { %1062 = vmatprep.subr.bf16.mxu0 %v1115_v32  ;;  %1045 = vmatpush3.bf16.msra.mxu1 %v1044_v61  ;;  %v633_v61 = vld [vmem:[%s1551_s7 + $0x30] sm:$0xff] }
 0x19d   :  { %1047 = vmatprep.subr.bf16.mxu1 %v1046_v4  ;;  %v1078_v63 = vpack.c.bf16 %v634_v62, %v633_v61  ;;  %v1084_v4 = vpack.c.bf16 %v638_v3, %v637_v2 }
 0x19f   :  { %1064 = vmatpush3.bf16.msra.mxu0 %v1063_v1 }
 0x1a0   :  { %1065 = vmatprep.subr.bf16.mxu0 %v1115_v32  ;;  %1049 = vmatpush3.bf16.msra.mxu1 %v1048_v8  ;;  %v641_v8 = vld [vmem:[%s1551_s7 + $0x70] sm:$0xff] }
 0x1a1   :  { %1068 = vmatprep.subr.bf16.mxu1 %v1115_v32  ;;  %v1090_v10 = vpack.c.bf16 %v642_v9, %v641_v8 }
 0x1a3   :  { %1067 = vmatpush3.bf16.msra.mxu0 %v1066_v15 }
 0x25a   :  { %v371_v53 = vpop.f32.mrb[8].mxu0 }
 0x25b   :  { %v902_v55 = vpop.f32.mrb[9].mxu0  ;;  %v372_v0 = vadd.f32 %v727_v54, %v371_v53  ;;  %v629_v53 = vld [vmem:[%s1551_s7 + $0x10] sm:$0xff] }
 0x25d   :  { %v385_v11 = vmax.f32 %v372_v0, 0.0  ;;  %v636_v0 = vld [vmem:[%s1551_s7 + $0x48] sm:$0xff] }
 0x25f   :  { %v393_v17 = vrot.slane %v385_v11, 4  ;;  %v389_v19 = vrot.slane %v385_v11, 2  ;;  %v397_v27 = vrot.slane %v385_v11, 6 }
 0x261   :  { %v376_v7 = vpop.f32.mrb[10].mxu0 }
 0x262   :  { %v377_v12 = vadd.f32 %v727_v54, %v376_v7  ;;  %v905_v14 = vpop.f32.mrb[11].mxu0  ;;  %v1087_v7 = vpack.c.bf16 %v640_v6, %v639_v5 }
 0x264   :  { %v386_v16 = vmax.f32 %v377_v12, 0.0 }
 0x266   :  { %v406_v18 = vrot.slane %v386_v16, 4  ;;  %v402_v20 = vrot.slane %v386_v16, 2  ;;  %v410_v23 = vrot.slane %v386_v16, 6 }
 0x268   :  { %v1105_v21 = vpack.i.bf16 %v393_v17, %v406_v18  ;;  %v1100_v22 = vpack.i.bf16 %v389_v19, %v402_v20  ;;  %v1110_v29 = vpack.i.bf16 %v397_v27, %v410_v23 }
 0x269   :  { %v381_v24 = vpop.f32.mrb[12].mxu0 }
 0x26a   :  { %v382_v25 = vadd.f32 %v727_v54, %v381_v24  ;;  %1106 = vrot.lane.b32.xlu1 %v1105_v21, %s1118_s3  ;;  %1101 = vrot.lane.b32.xlu0 %v1100_v22, %s1121_s14  ;;  %v908_v26 = vpop.f32.mrb[13].mxu0  ;;  %v630_v54 = vld [vmem:[%s1551_s7 + $0x18] sm:$0xff] }
 0x26b   :  { %v1072_v57 = vpack.c.bf16 %v630_v54, %v629_v53 }
 0x26c   :  { %v387_v28 = vmax.f32 %v382_v25, 0.0 }
 0x26e   :  { %1111 = vrot.lane.b32.xlu0 %v1110_v29, %s1122_s5  ;;  %v415_v30 = vrot.slane %v387_v28, 2  ;;  %v419_v31 = vrot.slane %v387_v28, 4 }
 0x270   :  { %416 = vrot.lane.b32.xlu1 %v415_v30, %s1121_s14 }
 0x272   :  { %420 = vrot.lane.b32.xlu0 %v419_v31, %s1118_s3 }
 0x2dc   :  { %v1107_v33 = vpop.permute.xlu1 %1106  ;;  %v1102_v34 = vpop.permute.xlu0 %1101 }
 0x2dd   :  { %v1104_v35 = vunpack.i.h.bf16 %v1102_v34  ;;  %v1103_v36 = vunpack.i.l.bf16 %v1102_v34  ;;  %v1109_v37 = vunpack.i.h.bf16 %v1107_v33  ;;  %v1108_v38 = vunpack.i.l.bf16 %v1107_v33 }
 0x2df   :  { %v427_v39 = vsel %vm266_vm5, %v386_v16, %v1103_v36  ;;  %v423_v40 = vsel %vm266_vm5, %v385_v11, %v1104_v35  ;;  %v14_v11 = vstv %s1552_s8 }
 0x2e0   :  { %v1112_v43 = vpop.permute.xlu0 %1111  ;;  %v428_v47 = vsel %vm274_vm7, %v427_v39, %v1108_v38  ;;  %v424_v48 = vsel %vm274_vm7, %v423_v40, %v1109_v37  ;;  %15 = vst [vmem:[#allocation2] sm:$0x1] %v14_v11 }
 0x2e1   :  { %v1114_v44 = vunpack.i.h.bf16 %v1112_v43  ;;  %v1113_v45 = vunpack.i.l.bf16 %v1112_v43 }
 0x2e2   :  { %v417_v46 = vpop.permute.xlu1 %416 }
 0x2e3   :  { %v430_v50 = vsel %vm266_vm5, %v387_v28, %v417_v46  ;;  %v429_v51 = vsel %vm425_vm9, %v428_v47, %v1113_v45  ;;  %v426_v52 = vsel %vm425_vm9, %v424_v48, %v1114_v44 }
 0x2e4   :  { %v421_v55 = vpop.permute.xlu0 %420  ;;  %550 = vmatprep.mubr.f32.mxu1 %v429_v51 }
 0x2e5   :  { %v431_v56 = vsel %vm274_vm7, %v430_v50, %v421_v55  ;;  %551 = vmatmul.mubr.f32.vlgmr.msra.gmra.mrb[0].mxu1 %v426_v52 }
 0x2e6   :  { %934 = vmatmul.mubr.msk.f32.vlgmr.msra.gmra.mrb[14].mxu0 %vm425_vm9, %v431_v56  ;;  %1070 = vmatpush3.bf16.msra.mxu1 %v1069_v49 }
 0x2e7   :  { %1071 = vmatprep.subr.bf16.mxu1 %v1115_v32  ;;  %968 = vmatprep.mubr.msk.f32.mxu1 %vm1116_vm1, %v1117_v13  ;;  %v635_v13 = vld [vmem:[%s1551_s7 + $0x40] sm:$0xff] }
 0x2e8   :  { %v1081_v1 = vpack.c.bf16 %v636_v0, %v635_v13  ;;  %v733_v21 = vld [vmem:[#allocation2] ss:$0 sm:$0xff] }
 0x2ea   :  { %1073 = vmatpush3.bf16.msra.mxu1 %v1072_v57 }
 0x2eb   :  { %1074 = vmatprep.subr.bf16.mxu1 %v1115_v32 }
 0x2ee   :  { %1076 = vmatpush3.bf16.msra.mxu1 %v1075_v60 }
 0x2ef   :  { %1077 = vmatprep.subr.bf16.mxu1 %v1115_v32 }
 0x2f2   :  { %1079 = vmatpush3.bf16.msra.mxu1 %v1078_v63 }
 0x2f3   :  { %1080 = vmatprep.subr.bf16.mxu1 %v1115_v32 }
 0x2f6   :  { %1082 = vmatpush3.bf16.msra.mxu1 %v1081_v1 }
 0x2f7   :  { %1083 = vmatprep.subr.bf16.mxu1 %v1115_v32 }
 0x2fa   :  { %1085 = vmatpush3.bf16.msra.mxu1 %v1084_v4 }
 0x2fb   :  { %1086 = vmatprep.subr.bf16.mxu1 %v1115_v32 }
 0x2fe   :  { %1088 = vmatpush3.bf16.msra.mxu1 %v1087_v7 }
 0x2ff   :  { %1089 = vmatprep.subr.bf16.mxu1 %v1115_v32  ;;  %v731_v32 = vld [vmem:[%s1553_s6] ss:$0 sm:$0xff] }
 0x302   :  { %1091 = vmatpush3.bf16.msra.mxu1 %v1090_v10 }
 0x3b8   :  { %v803_v12 = vpop.f32.mrb[0].mxu1 }
 0x3b9   :  { %v804_v14 = vpop.f32.mrb[1].mxu1  ;;  %v622_v15 = vpop.f32.mrb[14].mxu0 }
 0x3ba   :  { %v805_v16 = vadd.f32 %v804_v14, %v803_v12  ;;  %v935_v17 = vpop.f32.mrb[15].mxu0 }
 0x3bc   :  { %v553_v18 = vadd.f32 %v805_v16, %v731_v32 }
 0x3be   :  { %v623_v19 = vadd.f32 %v622_v15, %v553_v18 }
 0x3c0   :  { %v626_v20 = vmax.f32 %v623_v19, 0.0 }
 0x3c2   :  { %969 = vmatmul.mubr.f32.vlgmr.msra.gmra.mrb[2].mxu1 %v626_v20 }
 0x495   :  { %v716_v22 = vpop.f32.mrb[2].mxu1 }
 0x496   :  { %v717_v23 = vadd.f32 %v733_v21, %v716_v22  ;;  %v970_v24 = vpop.f32.mrb[3].mxu1 }
 0x498   :  { %721 = vst.msk [vmem:[%s1554_s9] sm:$0x3] %vm720_vm10, %v717_v23 }

</bundles_post_ra>
